<compile_context>
chip_gen: v7x
topology: tpu7x:2x2x1
jax: 0.10.0
libtpu: 0.0.40
codegen_flags: <defaults>
</compile_context>

<pallas_src>
import math
import functools

import jax
import jax.numpy as jnp
from jax import lax
from jax.experimental import pallas as pl
from jax.experimental.pallas import tpu as pltpu


# ----------------------------------------------------------------------------
# Kernel 1: fused Q/K/V projection, column-tiled weights.
#   q = (xq @ WqT + bq) * 1/sqrt(d_k)   (score scale folded into Q once)
#   k =  xk @ WkT + bk
#   v =  xv @ WvT + bv
# ----------------------------------------------------------------------------
def _qkv_kernel(xq_ref, xk_ref, xv_ref, wq_ref, wk_ref, wv_ref,
                bq_ref, bk_ref, bv_ref, q_ref, k_ref, v_ref, *, scale):
    q = jnp.dot(xq_ref[...], wq_ref[...], preferred_element_type=jnp.float32)
    q_ref[...] = ((q + bq_ref[...]) * scale).astype(q_ref.dtype)
    k = jnp.dot(xk_ref[...], wk_ref[...], preferred_element_type=jnp.float32)
    k_ref[...] = (k + bk_ref[...]).astype(k_ref.dtype)
    v = jnp.dot(xv_ref[...], wv_ref[...], preferred_element_type=jnp.float32)
    v_ref[...] = (v + bv_ref[...]).astype(v_ref.dtype)


def _qkv_proj(xq, xk, xv, wq_t, wk_t, wv_t, bq, bk, bv, *, scale, out_dtype,
              tm, tn, vmem_limit_bytes=None):
    R, d_in = xq.shape
    d_out = wq_t.shape[1]
    tm = min(tm, R)
    tn = min(tn, d_out)
    assert R % tm == 0 and d_out % tn == 0, "rows/cols must divide the tiles"

    x_spec = pl.BlockSpec((tm, d_in), lambda i, j: (i, 0))   # reused across j
    w_spec = pl.BlockSpec((d_in, tn), lambda i, j: (0, j))   # column tiled
    b_spec = pl.BlockSpec((1, tn), lambda i, j: (0, j))
    o_spec = pl.BlockSpec((tm, tn), lambda i, j: (i, j))     # lane-dense store
    shp = jax.ShapeDtypeStruct((R, d_out), out_dtype)

    return pl.pallas_call(
        functools.partial(_qkv_kernel, scale=scale),
        out_shape=(shp, shp, shp),
        grid_spec=pltpu.PrefetchScalarGridSpec(
            num_scalar_prefetch=0,
            grid=(R // tm, d_out // tn),
            in_specs=[x_spec, x_spec, x_spec,
                      w_spec, w_spec, w_spec,
                      b_spec, b_spec, b_spec],
            out_specs=(o_spec, o_spec, o_spec),
        ),
        compiler_params=pltpu.CompilerParams(
            dimension_semantics=("parallel", "arbitrary"),
            vmem_limit_bytes=vmem_limit_bytes,
        ),
    )(xq, xk, xv, wq_t, wk_t, wv_t, bq, bk, bv)


# ----------------------------------------------------------------------------
# Kernel 2: per-head flash attention, K/V full-sequence resident in VMEM.
#   grid = (B, H, S//TQ); q-tile axis innermost so the K/V block index
#   (b, ., h) is unchanged across consecutive steps -> fetched once per (b,h).
# ----------------------------------------------------------------------------
def _flash_head_kernel(q_ref, k_ref, v_ref, o_ref, *, tkv):
    # q_ref: (TQ, d_k) bf16 (already scaled by 1/sqrt(d_k))
    # k_ref, v_ref: (S, d_k) bf16, resident for the whole q sweep of this head
    q = q_ref[...]
    tq, d_k = q.shape
    num_kv = k_ref.shape[0] // tkv

    def body(j, carry):
        m_prev, l_prev, acc_prev = carry
        off = pl.multiple_of(j * tkv, tkv)
        k = k_ref[pl.ds(off, tkv), :]                       # (TKV, d_k)
        v = v_ref[pl.ds(off, tkv), :]                       # (TKV, d_k)
        # q @ k^T without materializing a transpose (contract minor dims).
        s = lax.dot_general(q, k, (((1,), (1,)), ((), ())),
                            preferred_element_type=jnp.float32)   # (TQ, TKV)
        m_new = jnp.maximum(m_prev, jnp.max(s, axis=-1, keepdims=True))
        alpha = jnp.exp(m_prev - m_new)                     # f32 stats
        p = jnp.exp(s - m_new)
        l_new = alpha * l_prev + jnp.sum(p, axis=-1, keepdims=True)
        acc_new = alpha * acc_prev + jnp.dot(
            p.astype(v.dtype), v, preferred_element_type=jnp.float32)
        return m_new, l_new, acc_new

    m0 = jnp.full((tq, 1), -jnp.inf, jnp.float32)
    l0 = jnp.zeros((tq, 1), jnp.float32)
    a0 = jnp.zeros((tq, d_k), jnp.float32)
    m, l, acc = lax.fori_loop(0, num_kv, body, (m0, l0, a0))

    inv_l = pl.reciprocal(l, approx=True)                   # EUP slot
    o_ref[...] = (acc * inv_l).astype(o_ref.dtype)


def _flash_attention(qh, kh, vh, *, num_heads, tq, tkv, out_dtype, packed,
                     vmem_limit_bytes=None):
    if packed:
        # Inputs / output are packed (B, S, D); heads are column blocks of the
        # BlockSpec (requires d_k % 128 == 0 for lane-aligned blocks).
        B, S, D = qh.shape
        d_k = D // num_heads
        q_spec = pl.BlockSpec((pl.Squeezed(), tq, d_k),
                              lambda b, h, qi: (b, qi, h))
        kv_spec = pl.BlockSpec((pl.Squeezed(), S, d_k),
                               lambda b, h, qi: (b, 0, h))
        out_spec = pl.BlockSpec((pl.Squeezed(), tq, d_k),
                                lambda b, h, qi: (b, qi, h))
        out_shape = jax.ShapeDtypeStruct((B, S, D), out_dtype)
    else:
        # Fallback for lane-unaligned d_k: inputs are (B, H, S, d_k).
        B, H, S, d_k = qh.shape
        q_spec = pl.BlockSpec((pl.Squeezed(), pl.Squeezed(), tq, d_k),
                              lambda b, h, qi: (b, h, qi, 0))
        kv_spec = pl.BlockSpec((pl.Squeezed(), pl.Squeezed(), S, d_k),
                               lambda b, h, qi: (b, h, 0, 0))
        out_spec = pl.BlockSpec((pl.Squeezed(), pl.Squeezed(), tq, d_k),
                                lambda b, h, qi: (b, h, qi, 0))
        out_shape = jax.ShapeDtypeStruct((B, H, S, d_k), out_dtype)

    return pl.pallas_call(
        functools.partial(_flash_head_kernel, tkv=tkv),
        out_shape=out_shape,
        grid_spec=pltpu.PrefetchScalarGridSpec(
            num_scalar_prefetch=0,
            grid=(B, num_heads, S // tq),
            in_specs=[q_spec, kv_spec, kv_spec],
            out_specs=out_spec,
        ),
        compiler_params=pltpu.CompilerParams(
            # qi kept "arbitrary" so K/V stay resident across the q sweep;
            # B*H parallel blocks feed the v7x dual TensorCores.
            dimension_semantics=("parallel", "parallel", "arbitrary"),
            vmem_limit_bytes=vmem_limit_bytes,
        ),
    )(qh, kh, vh)


# ----------------------------------------------------------------------------
# Kernel 3: column-tiled Linear (output projection), full K=D contraction.
# ----------------------------------------------------------------------------
def _linear_kernel(x_ref, w_ref, b_ref, o_ref):
    y = jnp.dot(x_ref[...], w_ref[...], preferred_element_type=jnp.float32)
    o_ref[...] = (y + b_ref[...]).astype(o_ref.dtype)


def _linear(x2d, w_t, b, *, out_dtype, tm, tn, vmem_limit_bytes=None):
    R, d_in = x2d.shape
    d_out = w_t.shape[1]
    tm = min(tm, R)
    tn = min(tn, d_out)
    assert R % tm == 0 and d_out % tn == 0, "rows/cols must divide the tiles"
    return pl.pallas_call(
        _linear_kernel,
        out_shape=jax.ShapeDtypeStruct((R, d_out), out_dtype),
        grid_spec=pltpu.PrefetchScalarGridSpec(
            num_scalar_prefetch=0,
            grid=(R // tm, d_out // tn),
            in_specs=[pl.BlockSpec((tm, d_in), lambda i, j: (i, 0)),
                      pl.BlockSpec((d_in, tn), lambda i, j: (0, j)),
                      pl.BlockSpec((1, tn), lambda i, j: (0, j))],
            out_specs=pl.BlockSpec((tm, tn), lambda i, j: (i, j)),
        ),
        compiler_params=pltpu.CompilerParams(
            dimension_semantics=("parallel", "arbitrary"),
            vmem_limit_bytes=vmem_limit_bytes,
        ),
    )(x2d, w_t, b)


# ----------------------------------------------------------------------------
# Full forward pass (equivalent to MultiHeadedAttention.forward, eval mode)
# ----------------------------------------------------------------------------
def multi_headed_attention(query, key, value, params, *, num_heads,
                           tm=256, tn=512, tq=256, tkv=512,
                           compute_dtype=jnp.bfloat16, vmem_limit_bytes=None):
    # v7x note: per-head resident K/V keeps the attention kernel tiny
    # (~4*S*d_k bytes double-buffered); for very large D set
    # vmem_limit_bytes (~48 MiB) and/or reduce tn/tm for the projections.
    B, S, D = query.shape
    assert D % num_heads == 0
    d_k = D // num_heads
    scale = 1.0 / math.sqrt(d_k)
    R = B * S

    # ---- plain-JAX glue: weight pre-transpose, dtype casts (no layout copies
    #      of activations between kernels on the fast path) ----
    wq_t = params["wq"].T.astype(compute_dtype)
    wk_t = params["wk"].T.astype(compute_dtype)
    wv_t = params["wv"].T.astype(compute_dtype)
    wo_t = params["wo"].T.astype(compute_dtype)
    bq = params["bq"].reshape(1, D).astype(jnp.float32)
    bk = params["bk"].reshape(1, D).astype(jnp.float32)
    bv = params["bv"].reshape(1, D).astype(jnp.float32)
    bo = params["bo"].reshape(1, D).astype(jnp.float32)

    xq = query.reshape(R, D).astype(compute_dtype)
    xk = key.reshape(R, D).astype(compute_dtype)
    xv = value.reshape(R, D).astype(compute_dtype)

    # ---- fused Q/K/V projections (1/sqrt(d_k) folded into Q) ----
    Q, K, V = _qkv_proj(xq, xk, xv, wq_t, wk_t, wv_t, bq, bk, bv,
                        scale=scale, out_dtype=compute_dtype, tm=tm, tn=tn,
                        vmem_limit_bytes=vmem_limit_bytes)

    tq_ = min(tq, S)
    tkv_ = min(tkv, S)
    assert S % tq_ == 0 and S % tkv_ == 0, "sequence must divide the tiles"

    if d_k % 128 == 0:
        # Fast path: no head-split transpose at all; BlockSpecs slice per-head
        # column blocks straight out of the packed (B, S, D) projections.
        ctx = _flash_attention(
            Q.reshape(B, S, D), K.reshape(B, S, D), V.reshape(B, S, D),
            num_heads=num_heads, tq=tq_, tkv=tkv_, out_dtype=compute_dtype,
            packed=True, vmem_limit_bytes=vmem_limit_bytes)
        ctx2d = ctx.reshape(R, D)
    else:
        # Fallback for lane-unaligned d_k: one XLA head transpose each way.
        def split(x):
            return x.reshape(B, S, num_heads, d_k).transpose(0, 2, 1, 3)
        ctx_h = _flash_attention(
            split(Q.reshape(B, S, D)), split(K.reshape(B, S, D)),
            split(V.reshape(B, S, D)),
            num_heads=num_heads, tq=tq_, tkv=tkv_, out_dtype=compute_dtype,
            packed=False, vmem_limit_bytes=vmem_limit_bytes)
        ctx2d = ctx_h.transpose(0, 2, 1, 3).reshape(R, D)

    # ---- output projection: full K=D contraction in its own kernel ----
    out = _linear(ctx2d, wo_t, bo, out_dtype=query.dtype, tm=tm, tn=tn,
                  vmem_limit_bytes=vmem_limit_bytes)
    return out.reshape(B, S, D)


# ----------------------------------------------------------------------------
# Pure-JAX reference (mirrors the PyTorch forward, eval mode, f32)
# ----------------------------------------------------------------------------
def reference_mha(query, key, value, params, *, num_heads):
    B, S, D = query.shape
    d_k = D // num_heads

    def lin(x, w, b):
        return x @ w.T + b

    def split_heads(x):
        return x.reshape(B, S, num_heads, d_k).transpose(0, 2, 1, 3)

    Q = split_heads(lin(query, params["wq"], params["bq"]))
    K = split_heads(lin(key, params["wk"], params["bk"]))
    V = split_heads(lin(value, params["wv"], params["bv"]))

    scores = jnp.einsum("bhqd,bhkd->bhqk", Q, K) / math.sqrt(d_k)
    p = jax.nn.softmax(scores, axis=-1)
    x = jnp.einsum("bhqk,bhkd->bhqd", p, V)
    x = x.transpose(0, 2, 1, 3).reshape(B, S, D)
    return lin(x, params["wo"], params["bo"])


if __name__ == "__main__":
    # Small shapes; d_k = 128 (the realistic head width) exercises the packed,
    # transpose-free fast path.
    B, S, D, H = 2, 16, 256, 2   # batch, seq, d_model, heads (d_k = 128)

    key0 = jax.random.PRNGKey(0)
    ks = jax.random.split(key0, 11)
    bound = 1.0 / math.sqrt(D)

    def u(k, shape):
        return jax.random.uniform(k, shape, jnp.float32, -bound, bound)

    params = {
        "wq": u(ks[0], (D, D)), "bq": u(ks[1], (D,)),
        "wk": u(ks[2], (D, D)), "bk": u(ks[3], (D,)),
        "wv": u(ks[4], (D, D)), "bv": u(ks[5], (D,)),
        "wo": u(ks[6], (D, D)), "bo": u(ks[7], (D,)),
    }

    query = jax.random.normal(ks[8], (B, S, D), jnp.float32)
    key_in = jax.random.normal(ks[9], (B, S, D), jnp.float32)
    value = jax.random.normal(ks[10], (B, S, D), jnp.float32)

    fwd = jax.jit(functools.partial(multi_headed_attention, num_heads=H))
    out = jax.block_until_ready(fwd(query, key_in, value, params))

    ref = reference_mha(query, key_in, value, params, num_heads=H)
    assert out.shape == (B, S, D)
    max_err = float(jnp.max(jnp.abs(out - ref)))
    # bf16 MXU operands + approx reciprocal => looser tolerance than pure f32.
    assert jnp.allclose(out, ref, atol=5e-2, rtol=5e-2), \
        f"mismatch vs reference (max abs err {max_err})"

    print("KERNEL_OK")
</pallas_src>

<mosaic_0001>
module attributes {stable_mosaic.version = 11 : i64} {
  func.func @_qkv_kernel(%arg0: i32, %arg1: i32, %arg2: memref<32x256xbf16, #tpu.memory_space<vmem>>, %arg3: memref<32x256xbf16, #tpu.memory_space<vmem>>, %arg4: memref<32x256xbf16, #tpu.memory_space<vmem>>, %arg5: memref<256x256xbf16, #tpu.memory_space<vmem>>, %arg6: memref<256x256xbf16, #tpu.memory_space<vmem>>, %arg7: memref<256x256xbf16, #tpu.memory_space<vmem>>, %arg8: memref<1x256xf32, #tpu.memory_space<vmem>>, %arg9: memref<1x256xf32, #tpu.memory_space<vmem>>, %arg10: memref<1x256xf32, #tpu.memory_space<vmem>>, %arg11: memref<32x256xbf16, #tpu.memory_space<vmem>>, %arg12: memref<32x256xbf16, #tpu.memory_space<vmem>>, %arg13: memref<32x256xbf16, #tpu.memory_space<vmem>>) attributes {dimension_semantics = [#tpu.dimension_semantics<parallel>, #tpu.dimension_semantics<arbitrary>], iteration_bounds = array<i64: 1, 1>, scalar_prefetch = 0 : i64, scratch_operands = 0 : i64, tpu.core_type = #tpu.core_type<tc>, window_params = [{transform_indices = @transform_0, window_bounds = array<i64: 32, 256>}, {transform_indices = @transform_1, window_bounds = array<i64: 32, 256>}, {transform_indices = @transform_2, window_bounds = array<i64: 32, 256>}, {transform_indices = @transform_3, window_bounds = array<i64: 256, 256>}, {transform_indices = @transform_4, window_bounds = array<i64: 256, 256>}, {transform_indices = @transform_5, window_bounds = array<i64: 256, 256>}, {transform_indices = @transform_6, window_bounds = array<i64: 1, 256>}, {transform_indices = @transform_7, window_bounds = array<i64: 1, 256>}, {transform_indices = @transform_8, window_bounds = array<i64: 1, 256>}, {transform_indices = @transform_9, window_bounds = array<i64: 32, 256>}, {transform_indices = @transform_10, window_bounds = array<i64: 32, 256>}, {transform_indices = @transform_11, window_bounds = array<i64: 32, 256>}]} {
    %c0 = arith.constant 0 : index
    %c0_0 = arith.constant 0 : index
    %0 = vector.load %arg2[%c0, %c0_0] : memref<32x256xbf16, #tpu.memory_space<vmem>>, vector<32x256xbf16>
    %c0_1 = arith.constant 0 : index
    %c0_2 = arith.constant 0 : index
    %1 = vector.load %arg5[%c0_1, %c0_2] : memref<256x256xbf16, #tpu.memory_space<vmem>>, vector<256x256xbf16>
    %cst = arith.constant dense<0.000000e+00> : vector<32x256xf32>
    %2 = tpu.matmul %0, %1, %cst {dimension_numbers = #tpu.dot_dimension_numbers<[1], [0], [0], [1], [0, 0, 1, 1], [], []>} : vector<32x256xbf16>, vector<256x256xbf16>, vector<32x256xf32> -> vector<32x256xf32>
    %c0_3 = arith.constant 0 : index
    %c0_4 = arith.constant 0 : index
    %3 = vector.load %arg8[%c0_3, %c0_4] : memref<1x256xf32, #tpu.memory_space<vmem>>, vector<1x256xf32>
    %4 = vector.broadcast %3 : vector<1x256xf32> to vector<32x256xf32>
    %5 = arith.addf %2, %4 : vector<32x256xf32>
    %cst_5 = arith.constant 0.0883883461 : f32
    %6 = vector.broadcast %cst_5 : f32 to vector<32x256xf32>
    %7 = arith.mulf %5, %6 : vector<32x256xf32>
    %8 = arith.truncf %7 : vector<32x256xf32> to vector<32x256xbf16>
    %c0_6 = arith.constant 0 : index
    %c0_7 = arith.constant 0 : index
    %9 = vector.load %arg11[%c0_6, %c0_7] : memref<32x256xbf16, #tpu.memory_space<vmem>>, vector<32x256xbf16>
    tpu.vector_store %arg11[%c0_6, %c0_7], %8 {strides = array<i32>} : memref<32x256xbf16, #tpu.memory_space<vmem>>, vector<32x256xbf16>,
    %c0_8 = arith.constant 0 : index
    %c0_9 = arith.constant 0 : index
    %10 = vector.load %arg3[%c0_8, %c0_9] : memref<32x256xbf16, #tpu.memory_space<vmem>>, vector<32x256xbf16>
    %c0_10 = arith.constant 0 : index
    %c0_11 = arith.constant 0 : index
    %11 = vector.load %arg6[%c0_10, %c0_11] : memref<256x256xbf16, #tpu.memory_space<vmem>>, vector<256x256xbf16>
    %cst_12 = arith.constant dense<0.000000e+00> : vector<32x256xf32>
    %12 = tpu.matmul %10, %11, %cst_12 {dimension_numbers = #tpu.dot_dimension_numbers<[1], [0], [0], [1], [0, 0, 1, 1], [], []>} : vector<32x256xbf16>, vector<256x256xbf16>, vector<32x256xf32> -> vector<32x256xf32>
    %c0_13 = arith.constant 0 : index
    %c0_14 = arith.constant 0 : index
    %13 = vector.load %arg9[%c0_13, %c0_14] : memref<1x256xf32, #tpu.memory_space<vmem>>, vector<1x256xf32>
    %14 = vector.broadcast %13 : vector<1x256xf32> to vector<32x256xf32>
    %15 = arith.addf %12, %14 : vector<32x256xf32>
    %16 = arith.truncf %15 : vector<32x256xf32> to vector<32x256xbf16>
    %c0_15 = arith.constant 0 : index
    %c0_16 = arith.constant 0 : index
    %17 = vector.load %arg12[%c0_15, %c0_16] : memref<32x256xbf16, #tpu.memory_space<vmem>>, vector<32x256xbf16>
    tpu.vector_store %arg12[%c0_15, %c0_16], %16 {strides = array<i32>} : memref<32x256xbf16, #tpu.memory_space<vmem>>, vector<32x256xbf16>,
    %c0_17 = arith.constant 0 : index
    %c0_18 = arith.constant 0 : index
    %18 = vector.load %arg4[%c0_17, %c0_18] : memref<32x256xbf16, #tpu.memory_space<vmem>>, vector<32x256xbf16>
    %c0_19 = arith.constant 0 : index
    %c0_20 = arith.constant 0 : index
    %19 = vector.load %arg7[%c0_19, %c0_20] : memref<256x256xbf16, #tpu.memory_space<vmem>>, vector<256x256xbf16>
    %cst_21 = arith.constant dense<0.000000e+00> : vector<32x256xf32>
    %20 = tpu.matmul %18, %19, %cst_21 {dimension_numbers = #tpu.dot_dimension_numbers<[1], [0], [0], [1], [0, 0, 1, 1], [], []>} : vector<32x256xbf16>, vector<256x256xbf16>, vector<32x256xf32> -> vector<32x256xf32>
    %c0_22 = arith.constant 0 : index
    %c0_23 = arith.constant 0 : index
    %21 = vector.load %arg10[%c0_22, %c0_23] : memref<1x256xf32, #tpu.memory_space<vmem>>, vector<1x256xf32>
    %22 = vector.broadcast %21 : vector<1x256xf32> to vector<32x256xf32>
    %23 = arith.addf %20, %22 : vector<32x256xf32>
    %24 = arith.truncf %23 : vector<32x256xf32> to vector<32x256xbf16>
    %c0_24 = arith.constant 0 : index
    %c0_25 = arith.constant 0 : index
    %25 = vector.load %arg13[%c0_24, %c0_25] : memref<32x256xbf16, #tpu.memory_space<vmem>>, vector<32x256xbf16>
    tpu.vector_store %arg13[%c0_24, %c0_25], %24 {strides = array<i32>} : memref<32x256xbf16, #tpu.memory_space<vmem>>, vector<32x256xbf16>,
    return
  }
  func.func @transform_0(%arg0: i32, %arg1: i32) -> (i32, i32) {
    %c0_i32 = arith.constant 0 : i32
    %c0_i32_0 = arith.constant 0 : i32
    return %arg0, %c0_i32 : i32, i32
  }
  func.func @transform_1(%arg0: i32, %arg1: i32) -> (i32, i32) {
    %c0_i32 = arith.constant 0 : i32
    %c0_i32_0 = arith.constant 0 : i32
    return %arg0, %c0_i32 : i32, i32
  }
  func.func @transform_2(%arg0: i32, %arg1: i32) -> (i32, i32) {
    %c0_i32 = arith.constant 0 : i32
    %c0_i32_0 = arith.constant 0 : i32
    return %arg0, %c0_i32 : i32, i32
  }
  func.func @transform_3(%arg0: i32, %arg1: i32) -> (i32, i32) {
    %c0_i32 = arith.constant 0 : i32
    %c0_i32_0 = arith.constant 0 : i32
    return %c0_i32, %arg1 : i32, i32
  }
  func.func @transform_4(%arg0: i32, %arg1: i32) -> (i32, i32) {
    %c0_i32 = arith.constant 0 : i32
    %c0_i32_0 = arith.constant 0 : i32
    return %c0_i32, %arg1 : i32, i32
  }
  func.func @transform_5(%arg0: i32, %arg1: i32) -> (i32, i32) {
    %c0_i32 = arith.constant 0 : i32
    %c0_i32_0 = arith.constant 0 : i32
    return %c0_i32, %arg1 : i32, i32
  }
  func.func @transform_6(%arg0: i32, %arg1: i32) -> (i32, i32) {
    %c0_i32 = arith.constant 0 : i32
    %c0_i32_0 = arith.constant 0 : i32
    return %c0_i32, %arg1 : i32, i32
  }
  func.func @transform_7(%arg0: i32, %arg1: i32) -> (i32, i32) {
    %c0_i32 = arith.constant 0 : i32
    %c0_i32_0 = arith.constant 0 : i32
    return %c0_i32, %arg1 : i32, i32
  }
  func.func @transform_8(%arg0: i32, %arg1: i32) -> (i32, i32) {
    %c0_i32 = arith.constant 0 : i32
    %c0_i32_0 = arith.constant 0 : i32
    return %c0_i32, %arg1 : i32, i32
  }
  func.func @transform_9(%arg0: i32, %arg1: i32) -> (i32, i32) {
    %c0_i32 = arith.constant 0 : i32
    return %arg0, %arg1 : i32, i32
  }
  func.func @transform_10(%arg0: i32, %arg1: i32) -> (i32, i32) {
    %c0_i32 = arith.constant 0 : i32
    return %arg0, %arg1 : i32, i32
  }
  func.func @transform_11(%arg0: i32, %arg1: i32) -> (i32, i32) {
    %c0_i32 = arith.constant 0 : i32
    return %arg0, %arg1 : i32, i32
  }
}

module attributes {stable_mosaic.version = 11 : i64} {
  func.func @_flash_head_kernel(%arg0: i32, %arg1: i32, %arg2: i32, %arg3: memref<1x16x128xbf16, #tpu.memory_space<vmem>>, %arg4: memref<1x16x128xbf16, #tpu.memory_space<vmem>>, %arg5: memref<1x16x128xbf16, #tpu.memory_space<vmem>>, %arg6: memref<1x16x128xbf16, #tpu.memory_space<vmem>>) attributes {dimension_semantics = [#tpu.dimension_semantics<parallel>, #tpu.dimension_semantics<parallel>, #tpu.dimension_semantics<arbitrary>], iteration_bounds = array<i64: 2, 2, 1>, scalar_prefetch = 0 : i64, scratch_operands = 0 : i64, tpu.core_type = #tpu.core_type<tc>, window_params = [{transform_indices = @transform_0, window_bounds = array<i64: 1, 16, 128>}, {transform_indices = @transform_1, window_bounds = array<i64: 1, 16, 128>}, {transform_indices = @transform_2, window_bounds = array<i64: 1, 16, 128>}, {transform_indices = @transform_3, window_bounds = array<i64: 1, 16, 128>}]} {
    %c0 = arith.constant 0 : index
    %c0_0 = arith.constant 0 : index
    %c0_1 = arith.constant 0 : index
    %0 = vector.load %arg3[%c0, %c0_0, %c0_1] : memref<1x16x128xbf16, #tpu.memory_space<vmem>>, vector<1x16x128xbf16>
    %1 = vector.shape_cast %0 : vector<1x16x128xbf16> to vector<16x128xbf16>
    %cst = arith.constant 0xFF800000 : f32
    %2 = vector.broadcast %cst : f32 to vector<16x1xf32>
    %cst_2 = arith.constant 0.000000e+00 : f32
    %3 = vector.broadcast %cst_2 : f32 to vector<16x1xf32>
    %cst_3 = arith.constant 0.000000e+00 : f32
    %4 = vector.broadcast %cst_3 : f32 to vector<16x128xf32>
    %c0_i32 = arith.constant 0 : i32
    %c16_i32 = arith.constant 16 : i32
    %5 = arith.muli %c0_i32, %c16_i32 : i32
    %6 = tpu.assume_multiple %5, 16 : i32
    %c0_4 = arith.constant 0 : index
    %7 = arith.index_cast %6 : i32 to index
    %c0_5 = arith.constant 0 : index
    %8 = vector.load %arg4[%c0_4, %7, %c0_5] : memref<1x16x128xbf16, #tpu.memory_space<vmem>>, vector<1x16x128xbf16>
    %9 = vector.shape_cast %8 : vector<1x16x128xbf16> to vector<16x128xbf16>
    %c0_6 = arith.constant 0 : index
    %10 = arith.index_cast %6 : i32 to index
    %c0_7 = arith.constant 0 : index
    %11 = vector.load %arg5[%c0_6, %10, %c0_7] : memref<1x16x128xbf16, #tpu.memory_space<vmem>>, vector<1x16x128xbf16>
    %12 = vector.shape_cast %11 : vector<1x16x128xbf16> to vector<16x128xbf16>
    %cst_8 = arith.constant dense<0.000000e+00> : vector<16x16xf32>
    %13 = tpu.matmul %1, %9, %cst_8 {dimension_numbers = #tpu.dot_dimension_numbers<[1], [1], [0], [0], [0, 0, 1, 0], [], []>} : vector<16x128xbf16>, vector<16x128xbf16>, vector<16x16xf32> -> vector<16x16xf32>
    %cst_9 = arith.constant dense<0xFF800000> : vector<16xf32>
    %14 = vector.multi_reduction <maximumf>, %13, %cst_9 [1] : vector<16x16xf32> to vector<16xf32>
    %15 = vector.shape_cast %14 : vector<16xf32> to vector<16x1xf32>
    %16 = arith.maximumf %2, %15 : vector<16x1xf32>
    %17 = arith.subf %2, %16 : vector<16x1xf32>
    %18 = math.exp %17 : vector<16x1xf32>
    %19 = vector.broadcast %16 : vector<16x1xf32> to vector<16x16xf32>
    %20 = arith.subf %13, %19 : vector<16x16xf32>
    %21 = math.exp %20 : vector<16x16xf32>
    %22 = arith.mulf %18, %3 : vector<16x1xf32>
    %cst_10 = arith.constant dense<0.000000e+00> : vector<16xf32>
    %23 = vector.multi_reduction <add>, %21, %cst_10 [1] : vector<16x16xf32> to vector<16xf32>
    %24 = vector.shape_cast %23 : vector<16xf32> to vector<16x1xf32>
    %25 = arith.addf %22, %24 : vector<16x1xf32>
    %26 = vector.broadcast %18 : vector<16x1xf32> to vector<16x128xf32>
    %27 = arith.mulf %26, %4 : vector<16x128xf32>
    %28 = arith.truncf %21 : vector<16x16xf32> to vector<16x16xbf16>
    %cst_11 = arith.constant dense<0.000000e+00> : vector<16x128xf32>
    %29 = tpu.matmul %28, %12, %cst_11 {dimension_numbers = #tpu.dot_dimension_numbers<[1], [0], [0], [1], [0, 0, 1, 1], [], []>} : vector<16x16xbf16>, vector<16x128xbf16>, vector<16x128xf32> -> vector<16x128xf32>
    %30 = arith.addf %27, %29 : vector<16x128xf32>
    %c1_i32 = arith.constant 1 : i32
    %31 = tpu.reciprocal %25 {approx = true} : vector<16x1xf32> -> vector<16x1xf32>
    %32 = vector.broadcast %31 : vector<16x1xf32> to vector<16x128xf32>
    %33 = arith.mulf %30, %32 : vector<16x128xf32>
    %34 = arith.truncf %33 : vector<16x128xf32> to vector<16x128xbf16>
    %c0_12 = arith.constant 0 : index
    %c0_13 = arith.constant 0 : index
    %c0_14 = arith.constant 0 : index
    %35 = vector.load %arg6[%c0_12, %c0_13, %c0_14] : memref<1x16x128xbf16, #tpu.memory_space<vmem>>, vector<1x16x128xbf16>
    %36 = vector.shape_cast %35 : vector<1x16x128xbf16> to vector<16x128xbf16>
    %37 = vector.shape_cast %34 : vector<16x128xbf16> to vector<1x16x128xbf16>
    tpu.vector_store %arg6[%c0_12, %c0_13, %c0_14], %37 {strides = array<i32>} : memref<1x16x128xbf16, #tpu.memory_space<vmem>>, vector<1x16x128xbf16>,
    return
  }
  func.func @transform_0(%arg0: i32, %arg1: i32, %arg2: i32) -> (i32, i32, i32) {
    %c0_i32 = arith.constant 0 : i32
    return %arg0, %arg2, %arg1 : i32, i32, i32
  }
  func.func @transform_1(%arg0: i32, %arg1: i32, %arg2: i32) -> (i32, i32, i32) {
    %c0_i32 = arith.constant 0 : i32
    %c0_i32_0 = arith.constant 0 : i32
    return %arg0, %c0_i32, %arg1 : i32, i32, i32
  }
  func.func @transform_2(%arg0: i32, %arg1: i32, %arg2: i32) -> (i32, i32, i32) {
    %c0_i32 = arith.constant 0 : i32
    %c0_i32_0 = arith.constant 0 : i32
    return %arg0, %c0_i32, %arg1 : i32, i32, i32
  }
  func.func @transform_3(%arg0: i32, %arg1: i32, %arg2: i32) -> (i32, i32, i32) {
    %c0_i32 = arith.constant 0 : i32
    return %arg0, %arg2, %arg1 : i32, i32, i32
  }
}

module attributes {stable_mosaic.version = 11 : i64} {
  func.func @_linear_kernel(%arg0: i32, %arg1: i32, %arg2: memref<32x256xbf16, #tpu.memory_space<vmem>>, %arg3: memref<256x256xbf16, #tpu.memory_space<vmem>>, %arg4: memref<1x256xf32, #tpu.memory_space<vmem>>, %arg5: memref<32x256xf32, #tpu.memory_space<vmem>>) attributes {dimension_semantics = [#tpu.dimension_semantics<parallel>, #tpu.dimension_semantics<arbitrary>], iteration_bounds = array<i64: 1, 1>, scalar_prefetch = 0 : i64, scratch_operands = 0 : i64, tpu.core_type = #tpu.core_type<tc>, window_params = [{transform_indices = @transform_0, window_bounds = array<i64: 32, 256>}, {transform_indices = @transform_1, window_bounds = array<i64: 256, 256>}, {transform_indices = @transform_2, window_bounds = array<i64: 1, 256>}, {transform_indices = @transform_3, window_bounds = array<i64: 32, 256>}]} {
    %c0 = arith.constant 0 : index
    %c0_0 = arith.constant 0 : index
    %0 = vector.load %arg2[%c0, %c0_0] : memref<32x256xbf16, #tpu.memory_space<vmem>>, vector<32x256xbf16>
    %c0_1 = arith.constant 0 : index
    %c0_2 = arith.constant 0 : index
    %1 = vector.load %arg3[%c0_1, %c0_2] : memref<256x256xbf16, #tpu.memory_space<vmem>>, vector<256x256xbf16>
    %cst = arith.constant dense<0.000000e+00> : vector<32x256xf32>
    %2 = tpu.matmul %0, %1, %cst {dimension_numbers = #tpu.dot_dimension_numbers<[1], [0], [0], [1], [0, 0, 1, 1], [], []>} : vector<32x256xbf16>, vector<256x256xbf16>, vector<32x256xf32> -> vector<32x256xf32>
    %c0_3 = arith.constant 0 : index
    %c0_4 = arith.constant 0 : index
    %3 = vector.load %arg4[%c0_3, %c0_4] : memref<1x256xf32, #tpu.memory_space<vmem>>, vector<1x256xf32>
    %4 = vector.broadcast %3 : vector<1x256xf32> to vector<32x256xf32>
    %5 = arith.addf %2, %4 : vector<32x256xf32>
    %c0_5 = arith.constant 0 : index
    %c0_6 = arith.constant 0 : index
    %6 = vector.load %arg5[%c0_5, %c0_6] : memref<32x256xf32, #tpu.memory_space<vmem>>, vector<32x256xf32>
    tpu.vector_store %arg5[%c0_5, %c0_6], %5 {strides = array<i32>} : memref<32x256xf32, #tpu.memory_space<vmem>>, vector<32x256xf32>,
    return
  }
  func.func @transform_0(%arg0: i32, %arg1: i32) -> (i32, i32) {
    %c0_i32 = arith.constant 0 : i32
    %c0_i32_0 = arith.constant 0 : i32
    return %arg0, %c0_i32 : i32, i32
  }
  func.func @transform_1(%arg0: i32, %arg1: i32) -> (i32, i32) {
    %c0_i32 = arith.constant 0 : i32
    %c0_i32_0 = arith.constant 0 : i32
    return %c0_i32, %arg1 : i32, i32
  }
  func.func @transform_2(%arg0: i32, %arg1: i32) -> (i32, i32) {
    %c0_i32 = arith.constant 0 : i32
    %c0_i32_0 = arith.constant 0 : i32
    return %c0_i32, %arg1 : i32, i32
  }
  func.func @transform_3(%arg0: i32, %arg1: i32) -> (i32, i32) {
    %c0_i32 = arith.constant 0 : i32
    return %arg0, %arg1 : i32, i32
  }
}

</mosaic_0001>

<bundles_post_ra>
// kernel: multi_headed_attention.4
= control target key start
LH: loop header
LB: loop body
LE: loop exit
PB: predicated region body
PF: predicated region fallthrough
CT: control target
= control target key end

     0   :  { %s917_s12 = smov 0   ;;  %s919_s13 = smov 0   ;;  %s1046_s0 = inlined_call_operand.vmem [shape: bf16[2,16,256], index: 0, kind: input, shape index: {}]   ;;  %s1047_s1 = inlined_call_operand.vmem [shape: bf16[2,16,256], index: 1, kind: input, shape index: {}]   ;;  %s1048_s2 = inlined_call_operand.vmem [shape: bf16[2,16,256], index: 2, kind: input, shape index: {}]   ;;  %s1049_s3 = inlined_call_operand.vmem [shape: bf16[2,16,256], index: 3, kind: output, shape index: {}]  }
   0x1   :  { %s921_s14 = smov 0   ;;  %s923_s15 = smov 0  }
   0x2   :  { %s925_s16 = smov 0   ;;  %s927_s17 = smov 0  }
   0x3   :  { %s929_s18 = smov 0  }
   0x4 LB: > { %s28_s19 = sadd.s32 1, %s885_s16  ;;  %s32_s20 = sadd.s32 1, %s889_s17  ;;  %s893_s18 = sphi %s929_s18, %s13_s18   ;;  %s889_s17 = sphi %s927_s17, %s1057_s17   ;;  %s885_s16 = sphi %s925_s16, %s1056_s16   ;;  %s881_s15 = sphi %s923_s15, %s1055_s15   ;;  %s877_s14 = sphi %s921_s14, %s1054_s14   ;;  %s873_s13 = sphi %s919_s13, %s1053_s13   ;;  %s869_s12 = sphi %s917_s12, %s1052_s12  }
   0x5   : > { %p30_p0 = scmp.ge.s32.totalorder %s28_s19, 2  ;;  %s714_s21 = sadd.s32 4294967295, %s893_s18  }
   0x6   : > { %p50_p1 = scmp.ne.s32.totalorder %s873_s13, %s869_s12  ;;  %p51_p2 = scmp.eq.s32.totalorder %s893_s18, 0 }
   0x7   : > { %s1059_s19 = smov (%p30_p0, %s28_s19), 0  ;;  %s1061_s20 = smov (!%p30_p0, %s32_s20), %s889_s17 }
   0x8   : > { %p34_p3 = scmp.ge.s32.totalorder %s1061_s20, 2  ;;  %p140_p4 = scmp.eq.s32.totalorder %s714_s21, 3 }
   0x9   : > { %s39_s22 = ssub.s32 %s885_s16, %s1059_s19  ;;  %p963_p5 = por %p51_p2, %p50_p1 }
   0xa   : > { %s1063_s20 = smov (%p34_p3, %s1061_s20), 0  ;;  %p969_p6 = por %p140_p4, %p50_p1 }
   0xb   : > { %s36_s25 = ssub.s32 %s889_s17, %s1063_s20  ;;  %s43_s27 = sadd.s32 1, %s873_s13 }
   0xc   : > { %s40_s26 = sor.u32 %s39_s22, %s36_s25  ;;  %p717_p8 = scmp.ge.s32.totalorder %s893_s18, 4 }
   0xd   : > { %p41_p7 = scmp.eq.s32.totalorder %s40_s26, 0 }
   0xe   : > { %162 = sbr.rel (%p717_p8) target bundleno = 42 (0x2a), region = 16 }
   0xf   : > { %s977_s28 = scalar_select %p41_p7, %s873_s13, %s43_s27  }
  0x15   : > { %165 = sbr.rel (!%p963_p5) target bundleno = 28 (0x1c), region = 20  ;;  %s167_s29 = sand.u32 (%p963_p5), 1, %s873_s13  }
  0x16   : > { %s719_s30 = sshll.u32 (%p963_p5), %s889_s17, 2  ;;  %s718_s4 = sshll.u32 (%p963_p5), %s167_s29, 3 }
  0x17   : > { %s174_s5 = sadd.s32 (%p963_p5), %s885_s16, %s719_s30  ;;  %s169_s10 = scalar_lea.vmem (%p963_p5), [#allocation2], %s718_s4 }
  0x18   : > { %s720_s6 = sshll.u32 (%p963_p5), %s174_s5, 2 }
  0x19   : > { %s176_s9 = scalar_lea.vmem (%p963_p5), %s1046_s0, %s720_s6 }
  0x1a   : > { %v192_v0 = vld [vmem:[%s176_s9] sm:$0xf] (%p963_p5)  ;;  %v194_v1 = vld [vmem:[%s176_s9 + $0x8] sm:$0xf] (%p963_p5) }
  0x1b   : > { %193 = vst [vmem:[%s169_s10] sm:$0xf] (%p963_p5), %v192_v0  ;;  %195 = vst [vmem:[%s169_s10 + $0x4] sm:$0xf] (%p963_p5), %v194_v1 }
  0x1c PF: > { %222 = sbr.rel (!%p963_p5) target bundleno = 35 (0x23), region = 61  ;;  %s224_s11 = sand.u32 (%p963_p5), 1, %s873_s13  }
  0x1d   : > { %s722_s21 = sshll.u32 (%p963_p5), %s889_s17, 2  ;;  %s721_s22 = sshll.u32 (%p963_p5), %s224_s11, 3 }
  0x1e   : > { %s228_s25 = sadd.s32 (%p963_p5), %s885_s16, %s722_s21  ;;  %s226_s4 = scalar_lea.vmem (%p963_p5), [#allocation3], %s721_s22 }
  0x1f   : > { %s723_s26 = sshll.u32 (%p963_p5), %s228_s25, 2 }
  0x20   : > { %s230_s30 = scalar_lea.vmem (%p963_p5), %s1047_s1, %s723_s26 }
  0x21   : > { %v246_v2 = vld [vmem:[%s230_s30] sm:$0xf] (%p963_p5)  ;;  %v248_v3 = vld [vmem:[%s230_s30 + $0x8] sm:$0xf] (%p963_p5) }
  0x22   : > { %247 = vst [vmem:[%s226_s4] sm:$0xf] (%p963_p5), %v246_v2  ;;  %249 = vst [vmem:[%s226_s4 + $0x4] sm:$0xf] (%p963_p5), %v248_v3 }
  0x23 PF: > { %276 = sbr.rel (!%p963_p5) target bundleno = 42 (0x2a), region = 102  ;;  %s278_s5 = sand.u32 (%p963_p5), 1, %s873_s13  }
  0x24   : > { %s725_s6 = sshll.u32 (%p963_p5), %s889_s17, 2  ;;  %s724_s7 = sshll.u32 (%p963_p5), %s278_s5, 3 }
  0x25   : > { %s282_s8 = sadd.s32 (%p963_p5), %s885_s16, %s725_s6  ;;  %s280_s22 = scalar_lea.vmem (%p963_p5), [#allocation4], %s724_s7 }
  0x26   : > { %s726_s9 = sshll.u32 (%p963_p5), %s282_s8, 2 }
  0x27   : > { %s284_s21 = scalar_lea.vmem (%p963_p5), %s1048_s2, %s726_s9 }
  0x28   : > { %v300_v4 = vld [vmem:[%s284_s21] sm:$0xf] (%p963_p5)  ;;  %v302_v5 = vld [vmem:[%s284_s21 + $0x8] sm:$0xf] (%p963_p5) }
  0x29   : > { %301 = vst [vmem:[%s280_s22] sm:$0xf] (%p963_p5), %v300_v4  ;;  %303 = vst [vmem:[%s280_s22 + $0x4] sm:$0xf] (%p963_p5), %v302_v5 }
  0x2a PF: > { %p727_p9 = scmp.ge.s32.totalorder %s893_s18, 1  ;;  %p329_p10 = scmp.lt.s32.totalorder %s893_s18, 5 }
  0x2c   : > { %p330_p11 = pnand %p727_p9, %p329_p10 }
  0x2d   : > { %s336_s23 = sand.u32 (!%p330_p11), 1, %s869_s12   ;;  %v895_v6 = vmov (!%p330_p11), 0.0   ;;  %vm896_vm0 = vmmov (!%p330_p11), 0   ;;  %vm442_vm1 = vcmask (!%p330_p11), 130048  }
  0x2e   : > { %333 = sbr.rel (%p330_p11) target bundleno = 661 (0x295), region = 143  ;;  %754 = vmatprep.subr.bf16.mxu0 (!%p330_p11), %v895_v6  ;;  %s1007_s25 = sshll.u32 (!%p330_p11), %s336_s23, 3  ;;  %756 = vmatprep.mubr.msk.bf16.mxu0 (!%p330_p11), %vm896_vm0, %v895_v6 }
  0x2f   : > { %760 = vmatprep.subr.bf16.mxu1 (!%p330_p11), %v895_v6  ;;  %762 = vmatprep.mubr.msk.bf16.mxu1 (!%p330_p11), %vm896_vm0, %v895_v6  ;;  %s345_s26 = scalar_lea.vmem (!%p330_p11), [#allocation3], %s1007_s25  ;;  %s338_s27 = scalar_lea.vmem (!%p330_p11), [#allocation2], %s1007_s25 }
  0x30   : > { %v824_v7 = vld [vmem:[%s345_s26] sm:$0xff] (!%p330_p11)   ;;  %v825_v8 = vld [vmem:[%s338_s27] sm:$0xff] (!%p330_p11)   ;;  %s352_s12 = scalar_lea.vmem (!%p330_p11), [#allocation4], %s1007_s25  ;;  %s379_s29 = scalar_lea.vmem (!%p330_p11), [#allocation5], %s1007_s25 }
  0x31   : > { %755 = vmatpush3.bf16.xpose.msra.mxu0 (!%p330_p11), %v824_v7  ;;  %v826_v15 = vld [vmem:[%s352_s12] sm:$0xff] (!%p330_p11)  }
  0x32   : > { %761 = vmatpush3.bf16.msra.mxu1 (!%p330_p11), %v826_v15 }
  0x35   : > { %s739_s30 = sshll.u32 (%p969_p6), %s881_s15, 2 }
  0x36   : > { %s549_s4 = sadd.s32 (%p969_p6), %s877_s14, %s739_s30 }
  0x37   : > { %s740_s5 = sshll.u32 (%p969_p6), %s549_s4, 2 }
  0x38   : > { %757 = vmatmul.mubr.bf16.vlgmr.msra.gmra.mrb[0].mxu0 %v825_v8  ;;  %s551_s8 = scalar_lea.vmem (%p969_p6), %s1049_s3, %s740_s5 }
 0x10b   : > { %v435_v9 = vpop.f32.mrb[0].mxu0 }
 0x10c   : > { %v758_v10 = vpop.f32.mrb[1].mxu0  ;;  %v443_v11 = vsel %vm442_vm1, %v435_v9, -inf }
 0x10d   : > { %444 = vmax.xlane.f32.xlu0 %v443_v11  ;;  %v438_v12 = vpop.f32.mrb[2].mxu0 }
 0x10e   : > { %v759_v13 = vpop.f32.mrb[3].mxu0  ;;  %v446_v14 = vsel %vm442_vm1, %v438_v12, -inf }
 0x111   : > { %447 = vmax.xlane.f32.xlu0 %v446_v14 }
 0x19a   : > { %v445_v16 = vpop.xlane.xlu0 %444 }
 0x19b   : > { %v455_v17 = vsub.f32 %v435_v9, %v445_v16  ;;  %v449_v27 = vsub.f32 -inf, %v445_v16 }
 0x19d   : > { %v457_v18 = vmul.f32 1.442695, %v455_v17  ;;  %v451_v29 = vmul.f32 1.442695, %v449_v27 }
 0x19e   : > { %v448_v19 = vpop.xlane.xlu0 %447 }
 0x19f   : > { %v456_v20 = vsub.f32 %v438_v12, %v448_v19  ;;  %827 = vpow2.f32 %v457_v18  ;;  %v450_v28 = vsub.f32 -inf, %v448_v19 }
 0x1a1   : > { %v459_v21 = vmul.f32 1.442695, %v456_v20  ;;  %v453_v30 = vmul.f32 1.442695, %v450_v28 }
 0x1a3   : > { %829 = vpow2.f32 %v459_v21 }
 0x1a4   : > { %831 = vpow2.f32 %v451_v29 }
 0x1a5   : > { %833 = vpow2.f32 %v453_v30 }
 0x1a9   : > { %v828_v22 = vpop.eup %827 }
 0x1aa   : > { %v463_v23 = vsel %vm442_vm1, %v828_v22, 0.0 }
 0x1ab   : > { %464 = vadd.xlane.f32.xlu1 %v463_v23 }
 0x1ad   : > { %v830_v24 = vpop.eup %829 }
 0x1ae   : > { %v466_v25 = vsel %vm442_vm1, %v830_v24, 0.0  ;;  %v471_v26 = vpack.c.bf16 %v830_v24, %v828_v22  ;;  %v832_v32 = vpop.eup %831 }
 0x1af   : > { %467 = vadd.xlane.f32.xlu1 %v466_v25  ;;  %v834_v33 = vpop.eup %833  ;;  %v461_v34 = vmul.f32 0.0, %v832_v32 }
 0x1b0   : > { %763 = vmatmul.mubr.msk.bf16.vlgmr.msra.gmra.mrb[0].mxu1 %vm442_vm1, %v471_v26  ;;  %v462_v37 = vmul.f32 0.0, %v834_v33 }
 0x238   : > { %v465_v31 = vpop.xlane.xlu1 %464 }
 0x239   : > { %v469_v36 = vadd.f32 %v465_v31, %v461_v34 }
 0x23b   : > { %835 = vrcp.f32 %v469_v36 }
 0x23c   : > { %v468_v35 = vpop.xlane.xlu1 %467 }
 0x23d   : > { %v470_v38 = vadd.f32 %v468_v35, %v462_v37 }
 0x23f   : > { %837 = vrcp.f32 %v470_v38 }
 0x245   : > { %v836_v42 = vpop.eup %835 }
 0x249   : > { %v838_v47 = vpop.eup %837 }
 0x283   : > { %v515_v39 = vpop.f32.mrb[0].mxu1 }
 0x284   : > { %v522_v40 = vadd.f32 %v515_v39, %v461_v34  ;;  %v764_v41 = vpop.f32.mrb[1].mxu1 }
 0x285   : > { %v518_v43 = vpop.f32.mrb[2].mxu1 }
 0x286   : > { %v526_v44 = vmul.f32 %v836_v42, %v522_v40  ;;  %v523_v45 = vadd.f32 %v518_v43, %v462_v37  ;;  %v765_v46 = vpop.f32.mrb[3].mxu1  ;;  %544 = sbr.rel (!%p969_p6) target bundleno = 661 (0x295), region = 159 }
 0x288   : > { %v527_v48 = vmul.f32 %v838_v47, %v523_v45 }
 0x28a   : > { %v748_v49 = vpack.c.bf16 %v527_v48, %v526_v44 }
 0x28c   : > { %749 = vst [vmem:[%s379_s29] sm:$0xff] %v748_v49  }
 0x293   : > { %v567_v50 = vld [vmem:[%s379_s29] sm:$0xf]  ;;  %v569_v51 = vld [vmem:[%s379_s29 + $0x4] sm:$0xf] }
 0x294   : > { %568 = vst [vmem:[%s551_s8] sm:$0xf] %v567_v50  ;;  %570 = vst [vmem:[%s551_s8 + $0x8] sm:$0xf] %v569_v51 }
 0x295 PF: > { %s13_s18 = sadd.s32 1, %s893_s18   ;;  %s1052_s12 = smov %s873_s13 }
 0x296   : > { %p10_p12 = scmp.ge.s32.totalorder %s13_s18, 6   ;;  %s1053_s13 = smov %s977_s28 }
 0x297   : > { %s1054_s14 = smov %s885_s16  ;;  %s1055_s15 = smov %s889_s17 }
 0x298   : > { %s1056_s16 = smov %s1059_s19  ;;  %s1057_s17 = smov %s1063_s20 }
 0x299   :  { %12 = sbr.rel (!%p10_p12) target bundleno = 4 (0x4), region = 247 }

// kernel: multi_headed_attention.5
= control target key start
LH: loop header
LB: loop body
LE: loop exit
PB: predicated region body
PF: predicated region fallthrough
CT: control target
= control target key end

     0   :  { %s615_s0 = inlined_call_operand.vmem [shape: bf16[32,256], index: 0, kind: input, shape index: {}]   ;;  %s616_s1 = inlined_call_operand.vmem [shape: bf16[256,256], index: 1, kind: input, shape index: {}]   ;;  %s617_s2 = inlined_call_operand.vmem [shape: f32[1,256], index: 2, kind: input, shape index: {}]   ;;  %s618_s3 = inlined_call_operand.hbm [shape: f32[32,256], index: 3, kind: output, shape index: {}]  }
   0x1   :  { %v391_v0 = vld [vmem:[%s616_s1 + $0x4] ss:$8 sps:$4 sm:$0xff]   ;;  %v393_v1 = vld [vmem:[%s616_s1] ss:$8 sps:$4 sm:$0xff]   ;;  %v394_v2 = vld [vmem:[%s616_s1 + $0x14] ss:$8 sps:$4 sm:$0xff]  }
   0x2   :  { %243 = vmatprep.subr.bf16.mxu0 %v391_v0  ;;  %356 = vmatprep.subr.bf16.mxu1 %v391_v0  ;;  %v396_v3 = vld [vmem:[%s616_s1 + $0x10] ss:$8 sps:$4 sm:$0xff]   ;;  %v397_v4 = vld [vmem:[%s616_s1 + $0x24] ss:$8 sps:$4 sm:$0xff]   ;;  %v399_v5 = vld [vmem:[%s616_s1 + $0x20] ss:$8 sps:$4 sm:$0xff]  }
   0x3   :  { %244 = vmatpush1.bf16.msra.mxu0 %v393_v1  ;;  %372 = vmatpush1.bf16.msra.mxu1 %v393_v1  ;;  %v400_v6 = vld [vmem:[%s616_s1 + $0x34] ss:$8 sps:$4 sm:$0xff]   ;;  %v402_v7 = vld [vmem:[%s616_s1 + $0x30] ss:$8 sps:$4 sm:$0xff]   ;;  %v403_v8 = vld [vmem:[%s616_s1 + $0x44] ss:$8 sps:$4 sm:$0xff]  }
   0x4   :  { %245 = vmatprep.subr.bf16.mxu0 %v394_v2  ;;  %357 = vmatprep.subr.bf16.mxu1 %v394_v2  ;;  %v405_v9 = vld [vmem:[%s616_s1 + $0x40] ss:$8 sps:$4 sm:$0xff]   ;;  %v406_v10 = vld [vmem:[%s616_s1 + $0x54] ss:$8 sps:$4 sm:$0xff]   ;;  %v408_v11 = vld [vmem:[%s616_s1 + $0x50] ss:$8 sps:$4 sm:$0xff]  }
   0x5   :  { %v409_v12 = vld [vmem:[%s616_s1 + $0x64] ss:$8 sps:$4 sm:$0xff]   ;;  %v411_v14 = vld [vmem:[%s616_s1 + $0x60] ss:$8 sps:$4 sm:$0xff]   ;;  %v444_v15 = vld [vmem:[%s615_s0 + $0x14] ss:$8 sps:$4 sm:$0xff]  }
   0x6   :  { %v441_v13 = vld [vmem:[%s615_s0 + $0x4] ss:$8 sps:$4 sm:$0xff]   ;;  %v412_v16 = vld [vmem:[%s616_s1 + $0x74] ss:$8 sps:$4 sm:$0xff]  }
   0x7   :  { %246 = vmatpush1.bf16.msra.mxu0 %v396_v3  ;;  %373 = vmatpush1.bf16.msra.mxu1 %v396_v3 }
   0x8   :  { %247 = vmatprep.subr.bf16.mxu0 %v397_v4  ;;  %358 = vmatprep.subr.bf16.mxu1 %v397_v4 }
   0xb   :  { %248 = vmatpush1.bf16.msra.mxu0 %v399_v5  ;;  %374 = vmatpush1.bf16.msra.mxu1 %v399_v5 }
   0xc   :  { %249 = vmatprep.subr.bf16.mxu0 %v400_v6  ;;  %359 = vmatprep.subr.bf16.mxu1 %v400_v6 }
   0xf   :  { %250 = vmatpush1.bf16.msra.mxu0 %v402_v7  ;;  %375 = vmatpush1.bf16.msra.mxu1 %v402_v7 }
  0x10   :  { %251 = vmatprep.subr.bf16.mxu0 %v403_v8  ;;  %360 = vmatprep.subr.bf16.mxu1 %v403_v8 }
  0x13   :  { %252 = vmatpush1.bf16.msra.mxu0 %v405_v9  ;;  %376 = vmatpush1.bf16.msra.mxu1 %v405_v9 }
  0x14   :  { %253 = vmatprep.subr.bf16.mxu0 %v406_v10  ;;  %361 = vmatprep.subr.bf16.mxu1 %v406_v10 }
  0x17   :  { %254 = vmatpush1.bf16.msra.mxu0 %v408_v11  ;;  %377 = vmatpush1.bf16.msra.mxu1 %v408_v11 }
  0x18   :  { %255 = vmatprep.subr.bf16.mxu0 %v409_v12  ;;  %362 = vmatprep.subr.bf16.mxu1 %v409_v12 }
  0x19   :  { %8 = vsyncpa [#allocation3], 0  ;;  %275 = vmatprep.mubr.bf16.mxu0 %v441_v13  ;;  %285 = vmatprep.mubr.bf16.mxu1 %v444_v15  ;;  %v414_v17 = vld [vmem:[%s616_s1 + $0x70] ss:$8 sps:$4 sm:$0xff]   ;;  %v415_v18 = vld [vmem:[%s616_s1 + $0x84] ss:$8 sps:$4 sm:$0xff]   ;;  %v53_v36 = vlaneseq }
  0x1a   :  { %v417_v19 = vld [vmem:[%s616_s1 + $0x80] ss:$8 sps:$4 sm:$0xff]   ;;  %v418_v20 = vld [vmem:[%s616_s1 + $0x94] ss:$8 sps:$4 sm:$0xff]   ;;  %v420_v21 = vld [vmem:[%s616_s1 + $0x90] ss:$8 sps:$4 sm:$0xff]  }
  0x1b   :  { %256 = vmatpush1.bf16.msra.mxu0 %v411_v14  ;;  %378 = vmatpush1.bf16.msra.mxu1 %v411_v14  ;;  %v421_v22 = vld [vmem:[%s616_s1 + $0xa4] ss:$8 sps:$4 sm:$0xff]   ;;  %v423_v23 = vld [vmem:[%s616_s1 + $0xa0] ss:$8 sps:$4 sm:$0xff]   ;;  %v424_v24 = vld [vmem:[%s616_s1 + $0xb4] ss:$8 sps:$4 sm:$0xff]  }
  0x1c   :  { %257 = vmatprep.subr.bf16.mxu0 %v412_v16  ;;  %363 = vmatprep.subr.bf16.mxu1 %v412_v16  ;;  %v426_v25 = vld [vmem:[%s616_s1 + $0xb0] ss:$8 sps:$4 sm:$0xff]   ;;  %v427_v26 = vld [vmem:[%s616_s1 + $0xc4] ss:$8 sps:$4 sm:$0xff]   ;;  %v429_v27 = vld [vmem:[%s616_s1 + $0xc0] ss:$8 sps:$4 sm:$0xff]  }
  0x1d   :  { %v430_v28 = vld [vmem:[%s616_s1 + $0xd4] ss:$8 sps:$4 sm:$0xff]   ;;  %v432_v29 = vld [vmem:[%s616_s1 + $0xd0] ss:$8 sps:$4 sm:$0xff]   ;;  %v433_v30 = vld [vmem:[%s616_s1 + $0xe4] ss:$8 sps:$4 sm:$0xff]  }
  0x1e   :  { %v435_v31 = vld [vmem:[%s616_s1 + $0xe0] ss:$8 sps:$4 sm:$0xff]   ;;  %v436_v32 = vld [vmem:[%s616_s1 + $0xf4] ss:$8 sps:$4 sm:$0xff]   ;;  %v438_v33 = vld [vmem:[%s616_s1 + $0xf0] ss:$8 sps:$4 sm:$0xff]  }
  0x1f   :  { %258 = vmatpush1.bf16.msra.mxu0 %v414_v17  ;;  %379 = vmatpush1.bf16.msra.mxu1 %v414_v17  ;;  %v439_v34 = vld [vmem:[%s615_s0] ss:$8 sps:$4 sm:$0xff]   ;;  %v442_v35 = vld [vmem:[%s615_s0 + $0x10] ss:$8 sps:$4 sm:$0xff]   ;;  %v54_v37 = vshrl.u32 %v53_v36, 7  ;;  %s469_s1 = smov [#allocation2]  }
  0x20   :  { %259 = vmatprep.subr.bf16.mxu0 %v415_v18  ;;  %364 = vmatprep.subr.bf16.mxu1 %v415_v18  ;;  %v51_v39 = vld [vmem:[%s617_s2] sm:$0x3]  ;;  %s309_s5 = sshll.u32 %s469_s1, 4  ;;  %s310_s5 = int_to_ptr.vmem [resolvable:$true] %s309_s5 }
  0x21   :  { %v55_v38 = vsub.s32 0, %v54_v37  ;;  %v59_v40 = vsub.s32 1, %v54_v37  ;;  %s445_s0 = scalar_lea.vmem %s310_s5, 1024  ;;  %p450_p1 = scmp.lt.s32.totalorder %s310_s5, %s310_s5 }
  0x22   :  { %p446_p0 = scmp.ne.s32.totalorder %s310_s5, %s445_s0  ;;  %p451_p2 = scmp.lt.s32.totalorder %s445_s0, %s445_s0 }
  0x23   :  { %260 = vmatpush1.bf16.msra.mxu0 %v417_v19  ;;  %380 = vmatpush1.bf16.msra.mxu1 %v417_v19  ;;  %v56_v41 = vrot.slane %v51_v39, %v55_v38  ;;  %v60_v42 = vrot.slane %v51_v39, %v59_v40 }
  0x24   :  { %261 = vmatprep.subr.bf16.mxu0 %v418_v20  ;;  %365 = vmatprep.subr.bf16.mxu1 %v418_v20  ;;  %p452_p3 = por %p451_p2, %p450_p1 }
  0x26   :  { %p453_p4 = pnand %p452_p3, %p446_p0 }
  0x27   :  { %262 = vmatpush1.bf16.msra.mxu0 %v420_v21  ;;  %381 = vmatpush1.bf16.msra.mxu1 %v420_v21 }
  0x28   :  { %263 = vmatprep.subr.bf16.mxu0 %v421_v22  ;;  %366 = vmatprep.subr.bf16.mxu1 %v421_v22 }
  0x2b   :  { %264 = vmatpush1.bf16.msra.mxu0 %v423_v23  ;;  %382 = vmatpush1.bf16.msra.mxu1 %v423_v23 }
  0x2c   :  { %265 = vmatprep.subr.bf16.mxu0 %v424_v24  ;;  %367 = vmatprep.subr.bf16.mxu1 %v424_v24 }
  0x2f   :  { %266 = vmatpush1.bf16.msra.mxu0 %v426_v25  ;;  %383 = vmatpush1.bf16.msra.mxu1 %v426_v25 }
  0x30   :  { %267 = vmatprep.subr.bf16.mxu0 %v427_v26  ;;  %368 = vmatprep.subr.bf16.mxu1 %v427_v26 }
  0x33   :  { %268 = vmatpush1.bf16.msra.mxu0 %v429_v27  ;;  %384 = vmatpush1.bf16.msra.mxu1 %v429_v27 }
  0x34   :  { %269 = vmatprep.subr.bf16.mxu0 %v430_v28  ;;  %369 = vmatprep.subr.bf16.mxu1 %v430_v28 }
  0x37   :  { %270 = vmatpush1.bf16.msra.mxu0 %v432_v29  ;;  %385 = vmatpush1.bf16.msra.mxu1 %v432_v29 }
  0x38   :  { %271 = vmatprep.subr.bf16.mxu0 %v433_v30  ;;  %370 = vmatprep.subr.bf16.mxu1 %v433_v30 }
  0x3b   :  { %272 = vmatpush1.bf16.msra.mxu0 %v435_v31  ;;  %386 = vmatpush1.bf16.msra.mxu1 %v435_v31 }
  0x3c   :  { %273 = vmatprep.subr.bf16.mxu0 %v436_v32  ;;  %371 = vmatprep.subr.bf16.mxu1 %v436_v32 }
  0x3f   :  { %274 = vmatpush1.bf16.msra.mxu0 %v438_v33  ;;  %387 = vmatpush1.bf16.msra.mxu1 %v438_v33 }
  0x42   :  { %276 = vmatmul.mubr.bf16.vlgmr.msra.gmra.mrb[0].mxu0 %v439_v34  ;;  %286 = vmatmul.mubr.bf16.vlgmr.msra.gmra.mrb[0].mxu1 %v442_v35 }
 0x115   :  { %v277_v43 = vpop.f32.mrb[0].mxu0  ;;  %v287_v44 = vpop.f32.mrb[0].mxu1 }
 0x116   :  { %v278_v45 = vadd.f32 %v277_v43, %v56_v41  ;;  %v288_v46 = vadd.f32 %v287_v44, %v56_v41  ;;  %v279_v47 = vpop.f32.mrb[1].mxu0  ;;  %v289_v48 = vpop.f32.mrb[1].mxu1 }
 0x117   :  { %v280_v49 = vadd.f32 %v279_v47, %v60_v42  ;;  %v290_v50 = vadd.f32 %v289_v48, %v60_v42  ;;  %v281_v51 = vpop.f32.mrb[2].mxu0  ;;  %v291_v52 = vpop.f32.mrb[2].mxu1 }
 0x118   :  { %296 = vst [vmem:[#allocation2] sm:$0xff] %v278_v45  ;;  %300 = vst [vmem:[#allocation2 + $0x20] sm:$0xff] %v288_v46  ;;  %v282_v53 = vadd.f32 %v281_v51, %v56_v41  ;;  %v292_v54 = vadd.f32 %v291_v52, %v56_v41  ;;  %v283_v55 = vpop.f32.mrb[3].mxu0  ;;  %v293_v56 = vpop.f32.mrb[3].mxu1 }
 0x119   :  { %297 = vst [vmem:[#allocation2 + $0x8] sm:$0xff] %v280_v49  ;;  %301 = vst [vmem:[#allocation2 + $0x28] sm:$0xff] %v290_v50  ;;  %v284_v57 = vadd.f32 %v283_v55, %v60_v42  ;;  %v294_v58 = vadd.f32 %v293_v56, %v60_v42 }
 0x11a   :  { %298 = vst [vmem:[#allocation2 + $0x10] sm:$0xff] %v282_v53  ;;  %302 = vst [vmem:[#allocation2 + $0x30] sm:$0xff] %v292_v54 }
 0x11b   :  { %299 = vst [vmem:[#allocation2 + $0x18] sm:$0xff] %v284_v57  ;;  %303 = vst [vmem:[#allocation2 + $0x38] sm:$0xff] %v294_v58 }
 0x11c   :  { %456 = shalt.err (!%p453_p4)
}
 0x11d   :  { %s457_s7 = scalar_lea.hbm %s618_s3, 1024 }
 0x11e   :  { %p458_p5 = scmp.ne.s32.totalorder %s618_s3, %s457_s7  ;;  %p461_p6 = scmp.lt.u32.totalorder %s457_s7, %s618_s3 }
 0x120   :  { %p463_p7 = pnand %p461_p6, %p458_p5 }
 0x122   :  { %466 = shalt.err (!%p463_p7)
}
 0x123   :  { %s470_s12 = smov 256   ;;  %s471_s13 = smov 16  }
 0x124   :  { %315 = dma.vmem_to_hbm [thread:$0]  %s310_s5, 1024, %s618_s3, [#allocation3], %s470_s12, %s470_s12, %s471_s13  }
 0x125   :  { %467 = dma.done.wait [#allocation3], 1024  }
 0x126   :  { %468 = vsyncadd [#allocation3], 4294966272 }
 0x127   :  { %319 = vsyncpa [#allocation3], 1 }

// kernel: multi_headed_attention.3
= control target key start
LH: loop header
LB: loop body
LE: loop exit
PB: predicated region body
PF: predicated region fallthrough
CT: control target
= control target key end

     0   :  { %s1747_s3 = inlined_call_operand.vmem [shape: bf16[256,256], index: 3, kind: input, shape index: {}]   ;;  %s1748_s4 = inlined_call_operand.vmem [shape: bf16[256,256], index: 4, kind: input, shape index: {}]   ;;  %s1749_s0 = inlined_call_operand.vmem [shape: bf16[32,256], index: 0, kind: input, shape index: {}]   ;;  %s1750_s1 = inlined_call_operand.vmem [shape: bf16[32,256], index: 1, kind: input, shape index: {}]   ;;  %s1751_s5 = inlined_call_operand.vmem [shape: bf16[256,256], index: 5, kind: input, shape index: {}]   ;;  %s1752_s2 = inlined_call_operand.vmem [shape: bf16[32,256], index: 2, kind: input, shape index: {}]   ;;  %s1753_s6 = inlined_call_operand.vmem [shape: f32[1,256], index: 6, kind: input, shape index: {}]   ;;  %s1754_s7 = inlined_call_operand.vmem [shape: f32[1,256], index: 7, kind: input, shape index: {}]   ;;  %s1755_s10 = inlined_call_operand.vmem [shape: bf16[32,256], index: 10, kind: output, shape index: {1}]   ;;  %s1756_s9 = inlined_call_operand.vmem [shape: bf16[32,256], index: 9, kind: output, shape index: {0}]   ;;  %s1757_s8 = inlined_call_operand.vmem [shape: f32[1,256], index: 8, kind: input, shape index: {}]   ;;  %s1758_s11 = inlined_call_operand.vmem [shape: bf16[32,256], index: 11, kind: output, shape index: {2}]  }
   0x1   :  { %v1146_v0 = vld [vmem:[%s1747_s3 + $0x4] ss:$8 sps:$4 sm:$0xff]   ;;  %v1150_v2 = vld [vmem:[%s1747_s3] ss:$8 sps:$4 sm:$0xff]   ;;  %v1152_v4 = vld [vmem:[%s1747_s3 + $0x14] ss:$8 sps:$4 sm:$0xff]  }
   0x2   :  { %v1148_v1 = vld [vmem:[%s1748_s4 + $0x4] ss:$8 sps:$4 sm:$0xff]   ;;  %263 = vmatprep.subr.bf16.mxu0 %v1146_v0  ;;  %v1151_v3 = vld [vmem:[%s1748_s4] ss:$8 sps:$4 sm:$0xff]   ;;  %v1154_v5 = vld [vmem:[%s1748_s4 + $0x14] ss:$8 sps:$4 sm:$0xff]  }
   0x3   :  { %580 = vmatprep.subr.bf16.mxu1 %v1148_v1  ;;  %264 = vmatpush1.bf16.msra.mxu0 %v1150_v2  ;;  %v1156_v6 = vld [vmem:[%s1747_s3 + $0x10] ss:$8 sps:$4 sm:$0xff]   ;;  %v1158_v8 = vld [vmem:[%s1747_s3 + $0x24] ss:$8 sps:$4 sm:$0xff]   ;;  %v1162_v10 = vld [vmem:[%s1747_s3 + $0x20] ss:$8 sps:$4 sm:$0xff]  }
   0x4   :  { %581 = vmatpush1.bf16.msra.mxu1 %v1151_v3  ;;  %265 = vmatprep.subr.bf16.mxu0 %v1152_v4  ;;  %v1157_v7 = vld [vmem:[%s1748_s4 + $0x10] ss:$8 sps:$4 sm:$0xff]   ;;  %v1160_v9 = vld [vmem:[%s1748_s4 + $0x24] ss:$8 sps:$4 sm:$0xff]   ;;  %v1163_v11 = vld [vmem:[%s1748_s4 + $0x20] ss:$8 sps:$4 sm:$0xff]  }
   0x5   :  { %582 = vmatprep.subr.bf16.mxu1 %v1154_v5  ;;  %v1164_v12 = vld [vmem:[%s1747_s3 + $0x34] ss:$8 sps:$4 sm:$0xff]   ;;  %v1168_v14 = vld [vmem:[%s1747_s3 + $0x30] ss:$8 sps:$4 sm:$0xff]   ;;  %v1170_v16 = vld [vmem:[%s1747_s3 + $0x44] ss:$8 sps:$4 sm:$0xff]  }
   0x6   :  { %v1166_v13 = vld [vmem:[%s1748_s4 + $0x34] ss:$8 sps:$4 sm:$0xff]   ;;  %v1169_v15 = vld [vmem:[%s1748_s4 + $0x30] ss:$8 sps:$4 sm:$0xff]   ;;  %v1172_v17 = vld [vmem:[%s1748_s4 + $0x44] ss:$8 sps:$4 sm:$0xff]  }
   0x7   :  { %266 = vmatpush1.bf16.msra.mxu0 %v1156_v6  ;;  %v1174_v18 = vld [vmem:[%s1747_s3 + $0x40] ss:$8 sps:$4 sm:$0xff]   ;;  %v1176_v20 = vld [vmem:[%s1747_s3 + $0x54] ss:$8 sps:$4 sm:$0xff]   ;;  %v1180_v22 = vld [vmem:[%s1747_s3 + $0x50] ss:$8 sps:$4 sm:$0xff]  }
   0x8   :  { %583 = vmatpush1.bf16.msra.mxu1 %v1157_v7  ;;  %267 = vmatprep.subr.bf16.mxu0 %v1158_v8  ;;  %v1175_v19 = vld [vmem:[%s1748_s4 + $0x40] ss:$8 sps:$4 sm:$0xff]   ;;  %v1178_v21 = vld [vmem:[%s1748_s4 + $0x54] ss:$8 sps:$4 sm:$0xff]   ;;  %v1181_v23 = vld [vmem:[%s1748_s4 + $0x50] ss:$8 sps:$4 sm:$0xff]  }
   0x9   :  { %584 = vmatprep.subr.bf16.mxu1 %v1160_v9  ;;  %v1182_v24 = vld [vmem:[%s1747_s3 + $0x64] ss:$8 sps:$4 sm:$0xff]   ;;  %v1186_v26 = vld [vmem:[%s1747_s3 + $0x60] ss:$8 sps:$4 sm:$0xff]   ;;  %v1188_v28 = vld [vmem:[%s1747_s3 + $0x74] ss:$8 sps:$4 sm:$0xff]  }
   0xa   :  { %v1184_v25 = vld [vmem:[%s1748_s4 + $0x64] ss:$8 sps:$4 sm:$0xff]   ;;  %v1187_v27 = vld [vmem:[%s1748_s4 + $0x60] ss:$8 sps:$4 sm:$0xff]   ;;  %v1190_v29 = vld [vmem:[%s1748_s4 + $0x74] ss:$8 sps:$4 sm:$0xff]  }
   0xb   :  { %268 = vmatpush1.bf16.msra.mxu0 %v1162_v10  ;;  %v1192_v30 = vld [vmem:[%s1747_s3 + $0x70] ss:$8 sps:$4 sm:$0xff]   ;;  %v1194_v32 = vld [vmem:[%s1747_s3 + $0x84] ss:$8 sps:$4 sm:$0xff]   ;;  %v1198_v34 = vld [vmem:[%s1747_s3 + $0x80] ss:$8 sps:$4 sm:$0xff]  }
   0xc   :  { %585 = vmatpush1.bf16.msra.mxu1 %v1163_v11  ;;  %269 = vmatprep.subr.bf16.mxu0 %v1164_v12  ;;  %v1193_v31 = vld [vmem:[%s1748_s4 + $0x70] ss:$8 sps:$4 sm:$0xff]   ;;  %v1196_v33 = vld [vmem:[%s1748_s4 + $0x84] ss:$8 sps:$4 sm:$0xff]   ;;  %v1199_v35 = vld [vmem:[%s1748_s4 + $0x80] ss:$8 sps:$4 sm:$0xff]  }
   0xd   :  { %586 = vmatprep.subr.bf16.mxu1 %v1166_v13  ;;  %v1200_v36 = vld [vmem:[%s1747_s3 + $0x94] ss:$8 sps:$4 sm:$0xff]   ;;  %v1204_v38 = vld [vmem:[%s1747_s3 + $0x90] ss:$8 sps:$4 sm:$0xff]   ;;  %v1206_v40 = vld [vmem:[%s1747_s3 + $0xa4] ss:$8 sps:$4 sm:$0xff]  }
   0xe   :  { %v1202_v37 = vld [vmem:[%s1748_s4 + $0x94] ss:$8 sps:$4 sm:$0xff]   ;;  %v1205_v39 = vld [vmem:[%s1748_s4 + $0x90] ss:$8 sps:$4 sm:$0xff]   ;;  %v1208_v41 = vld [vmem:[%s1748_s4 + $0xa4] ss:$8 sps:$4 sm:$0xff]  }
   0xf   :  { %270 = vmatpush1.bf16.msra.mxu0 %v1168_v14  ;;  %v1210_v42 = vld [vmem:[%s1747_s3 + $0xa0] ss:$8 sps:$4 sm:$0xff]   ;;  %v1212_v44 = vld [vmem:[%s1747_s3 + $0xb4] ss:$8 sps:$4 sm:$0xff]   ;;  %v1216_v46 = vld [vmem:[%s1747_s3 + $0xb0] ss:$8 sps:$4 sm:$0xff]  }
  0x10   :  { %587 = vmatpush1.bf16.msra.mxu1 %v1169_v15  ;;  %271 = vmatprep.subr.bf16.mxu0 %v1170_v16  ;;  %v1211_v43 = vld [vmem:[%s1748_s4 + $0xa0] ss:$8 sps:$4 sm:$0xff]   ;;  %v1214_v45 = vld [vmem:[%s1748_s4 + $0xb4] ss:$8 sps:$4 sm:$0xff]   ;;  %v1217_v47 = vld [vmem:[%s1748_s4 + $0xb0] ss:$8 sps:$4 sm:$0xff]  }
  0x11   :  { %588 = vmatprep.subr.bf16.mxu1 %v1172_v17  ;;  %v1218_v48 = vld [vmem:[%s1747_s3 + $0xc4] ss:$8 sps:$4 sm:$0xff]   ;;  %v1222_v52 = vld [vmem:[%s1747_s3 + $0xc0] ss:$8 sps:$4 sm:$0xff]   ;;  %v1224_v54 = vld [vmem:[%s1747_s3 + $0xd4] ss:$8 sps:$4 sm:$0xff]  }
  0x12   :  { %v1244_v49 = vld [vmem:[%s1749_s0 + $0x4] ss:$8 sps:$4 sm:$0xff]   ;;  %v1223_v53 = vld [vmem:[%s1748_s4 + $0xc0] ss:$8 sps:$4 sm:$0xff]   ;;  %v1226_v55 = vld [vmem:[%s1748_s4 + $0xd4] ss:$8 sps:$4 sm:$0xff]  }
  0x13   :  { %272 = vmatpush1.bf16.msra.mxu0 %v1174_v18  ;;  %v1220_v50 = vld [vmem:[%s1748_s4 + $0xc4] ss:$8 sps:$4 sm:$0xff]   ;;  %295 = vmatprep.mubr.bf16.mxu0 %v1244_v49  ;;  %v1228_v56 = vld [vmem:[%s1747_s3 + $0xd0] ss:$8 sps:$4 sm:$0xff]   ;;  %v1234_v60 = vld [vmem:[%s1747_s3 + $0xe0] ss:$8 sps:$4 sm:$0xff]  }
  0x14   :  { %589 = vmatpush1.bf16.msra.mxu1 %v1175_v19  ;;  %273 = vmatprep.subr.bf16.mxu0 %v1176_v20  ;;  %v1247_v51 = vld [vmem:[%s1750_s1 + $0x4] ss:$8 sps:$4 sm:$0xff]   ;;  %v1229_v57 = vld [vmem:[%s1748_s4 + $0xd0] ss:$8 sps:$4 sm:$0xff]   ;;  %v1235_v61 = vld [vmem:[%s1748_s4 + $0xe0] ss:$8 sps:$4 sm:$0xff]  }
  0x15   :  { %590 = vmatprep.subr.bf16.mxu1 %v1178_v21  ;;  %612 = vmatprep.mubr.bf16.mxu1 %v1247_v51  ;;  %v1230_v58 = vld [vmem:[%s1747_s3 + $0xe4] ss:$8 sps:$4 sm:$0xff]   ;;  %v1236_v62 = vld [vmem:[%s1747_s3 + $0xf4] ss:$8 sps:$4 sm:$0xff]   ;;  %v1240_v0 = vld [vmem:[%s1747_s3 + $0xf0] ss:$8 sps:$4 sm:$0xff]  }
  0x16   :  { %v1232_v59 = vld [vmem:[%s1748_s4 + $0xe4] ss:$8 sps:$4 sm:$0xff]   ;;  %v1238_v63 = vld [vmem:[%s1748_s4 + $0xf4] ss:$8 sps:$4 sm:$0xff]   ;;  %v1241_v1 = vld [vmem:[%s1748_s4 + $0xf0] ss:$8 sps:$4 sm:$0xff]  }
  0x17   :  { %274 = vmatpush1.bf16.msra.mxu0 %v1180_v22  ;;  %v1250_v2 = vld [vmem:[%s1751_s5 + $0x4] ss:$8 sps:$4 sm:$0xff]   ;;  %v1242_v3 = vld [vmem:[%s1749_s0] ss:$8 sps:$4 sm:$0xff]   ;;  %v1253_v6 = vld [vmem:[%s1751_s5 + $0x14] ss:$8 sps:$4 sm:$0xff]  }
  0x18   :  { %591 = vmatpush1.bf16.msra.mxu1 %v1181_v23  ;;  %275 = vmatprep.subr.bf16.mxu0 %v1182_v24  ;;  %v1245_v4 = vld [vmem:[%s1750_s1] ss:$8 sps:$4 sm:$0xff]   ;;  %v1287_v7 = vld [vmem:[%s1749_s0 + $0x14] ss:$8 sps:$4 sm:$0xff]   ;;  %v1251_v9 = vld [vmem:[%s1751_s5 + $0x10] ss:$8 sps:$4 sm:$0xff]  }
  0x19   :  { %592 = vmatprep.subr.bf16.mxu1 %v1184_v25  ;;  %v1248_v5 = vld [vmem:[%s1751_s5] ss:$8 sps:$4 sm:$0xff]   ;;  %v1289_v8 = vld [vmem:[%s1750_s1 + $0x14] ss:$8 sps:$4 sm:$0xff]   ;;  %v1256_v10 = vld [vmem:[%s1751_s5 + $0x24] ss:$8 sps:$4 sm:$0xff]  }
  0x1a   :  { %v1294_v11 = vld [vmem:[%s1749_s0 + $0x10] ss:$8 sps:$4 sm:$0xff]   ;;  %v1254_v13 = vld [vmem:[%s1751_s5 + $0x20] ss:$8 sps:$4 sm:$0xff]   ;;  %v1259_v14 = vld [vmem:[%s1751_s5 + $0x34] ss:$8 sps:$4 sm:$0xff]  }
  0x1b   :  { %276 = vmatpush1.bf16.msra.mxu0 %v1186_v26  ;;  %v1295_v12 = vld [vmem:[%s1750_s1 + $0x10] ss:$8 sps:$4 sm:$0xff]   ;;  %v1304_v15 = vld [vmem:[%s1752_s2 + $0x4] ss:$8 sps:$4 sm:$0xff]   ;;  %v1307_v16 = vld [vmem:[%s1752_s2 + $0x14] ss:$8 sps:$4 sm:$0xff]  }
  0x1c   :  { %593 = vmatpush1.bf16.msra.mxu1 %v1187_v27  ;;  %277 = vmatprep.subr.bf16.mxu0 %v1188_v28  ;;  %v1257_v17 = vld [vmem:[%s1751_s5 + $0x30] ss:$8 sps:$4 sm:$0xff]   ;;  %v1262_v18 = vld [vmem:[%s1751_s5 + $0x44] ss:$8 sps:$4 sm:$0xff]   ;;  %v1260_v19 = vld [vmem:[%s1751_s5 + $0x40] ss:$8 sps:$4 sm:$0xff]  }
  0x1d   :  { %594 = vmatprep.subr.bf16.mxu1 %v1190_v29  ;;  %v1265_v20 = vld [vmem:[%s1751_s5 + $0x54] ss:$8 sps:$4 sm:$0xff]   ;;  %v1263_v21 = vld [vmem:[%s1751_s5 + $0x50] ss:$8 sps:$4 sm:$0xff]   ;;  %v1268_v22 = vld [vmem:[%s1751_s5 + $0x64] ss:$8 sps:$4 sm:$0xff]  }
  0x1e   :  { %v1266_v23 = vld [vmem:[%s1751_s5 + $0x60] ss:$8 sps:$4 sm:$0xff]   ;;  %v1271_v24 = vld [vmem:[%s1751_s5 + $0x74] ss:$8 sps:$4 sm:$0xff]   ;;  %v1269_v25 = vld [vmem:[%s1751_s5 + $0x70] ss:$8 sps:$4 sm:$0xff]  }
  0x1f   :  { %278 = vmatpush1.bf16.msra.mxu0 %v1192_v30  ;;  %v1274_v26 = vld [vmem:[%s1751_s5 + $0x84] ss:$8 sps:$4 sm:$0xff]   ;;  %v1272_v27 = vld [vmem:[%s1751_s5 + $0x80] ss:$8 sps:$4 sm:$0xff]   ;;  %v1277_v28 = vld [vmem:[%s1751_s5 + $0x94] ss:$8 sps:$4 sm:$0xff]  }
  0x20   :  { %595 = vmatpush1.bf16.msra.mxu1 %v1193_v31  ;;  %279 = vmatprep.subr.bf16.mxu0 %v1194_v32  ;;  %v1275_v29 = vld [vmem:[%s1751_s5 + $0x90] ss:$8 sps:$4 sm:$0xff]   ;;  %v1280_v30 = vld [vmem:[%s1751_s5 + $0xa4] ss:$8 sps:$4 sm:$0xff]   ;;  %v1278_v31 = vld [vmem:[%s1751_s5 + $0xa0] ss:$8 sps:$4 sm:$0xff]  }
  0x21   :  { %596 = vmatprep.subr.bf16.mxu1 %v1196_v33  ;;  %v1283_v32 = vld [vmem:[%s1751_s5 + $0xb4] ss:$8 sps:$4 sm:$0xff]   ;;  %v1281_v33 = vld [vmem:[%s1751_s5 + $0xb0] ss:$8 sps:$4 sm:$0xff]  }
  0x23   :  { %280 = vmatpush1.bf16.msra.mxu0 %v1198_v34  ;;  %v1286_v34 = vld [vmem:[%s1751_s5 + $0xc4] ss:$8 sps:$4 sm:$0xff]  }
  0x24   :  { %597 = vmatpush1.bf16.msra.mxu1 %v1199_v35  ;;  %281 = vmatprep.subr.bf16.mxu0 %v1200_v36  ;;  %v1284_v35 = vld [vmem:[%s1751_s5 + $0xc0] ss:$8 sps:$4 sm:$0xff]   ;;  %v1293_v36 = vld [vmem:[%s1751_s5 + $0xd4] ss:$8 sps:$4 sm:$0xff]  }
  0x25   :  { %598 = vmatprep.subr.bf16.mxu1 %v1202_v37  ;;  %v1291_v37 = vld [vmem:[%s1751_s5 + $0xd0] ss:$8 sps:$4 sm:$0xff]  }
  0x27   :  { %282 = vmatpush1.bf16.msra.mxu0 %v1204_v38  ;;  %v1298_v38 = vld [vmem:[%s1751_s5 + $0xe4] ss:$8 sps:$4 sm:$0xff]  }
  0x28   :  { %599 = vmatpush1.bf16.msra.mxu1 %v1205_v39  ;;  %283 = vmatprep.subr.bf16.mxu0 %v1206_v40  ;;  %v1296_v39 = vld [vmem:[%s1751_s5 + $0xe0] ss:$8 sps:$4 sm:$0xff]   ;;  %v1301_v40 = vld [vmem:[%s1751_s5 + $0xf4] ss:$8 sps:$4 sm:$0xff]  }
  0x29   :  { %600 = vmatprep.subr.bf16.mxu1 %v1208_v41  ;;  %v1299_v41 = vld [vmem:[%s1751_s5 + $0xf0] ss:$8 sps:$4 sm:$0xff]  }
  0x2b   :  { %284 = vmatpush1.bf16.msra.mxu0 %v1210_v42  ;;  %v1302_v42 = vld [vmem:[%s1752_s2] ss:$8 sps:$4 sm:$0xff]  }
  0x2c   :  { %601 = vmatpush1.bf16.msra.mxu1 %v1211_v43  ;;  %285 = vmatprep.subr.bf16.mxu0 %v1212_v44  ;;  %v1305_v43 = vld [vmem:[%s1752_s2 + $0x10] ss:$8 sps:$4 sm:$0xff]   ;;  %v73_v44 = vlaneseq }
  0x2d   :  { %602 = vmatprep.subr.bf16.mxu1 %v1214_v45 }
  0x2e   :  { %v74_v45 = vshrl.u32 %v73_v44, 7 }
  0x2f   :  { %286 = vmatpush1.bf16.msra.mxu0 %v1216_v46 }
  0x30   :  { %603 = vmatpush1.bf16.msra.mxu1 %v1217_v47  ;;  %287 = vmatprep.subr.bf16.mxu0 %v1218_v48  ;;  %v1692_v46 = vsub.s32 0, %v74_v45  ;;  %v71_v47 = vld [vmem:[%s1753_s6] sm:$0x3]  ;;  %v1700_v49 = vsub.s32 1, %v74_v45 }
  0x31   :  { %604 = vmatprep.subr.bf16.mxu1 %v1220_v50  ;;  %v388_v48 = vld [vmem:[%s1754_s7] sm:$0x3] }
  0x32   :  { %v76_v50 = vrot.slane %v71_v47, %v1692_v46  ;;  %v393_v51 = vrot.slane %v388_v48, %v1692_v46 }
  0x33   :  { %288 = vmatpush1.bf16.msra.mxu0 %v1222_v52  ;;  %v80_v52 = vrot.slane %v71_v47, %v1700_v49 }
  0x34   :  { %605 = vmatpush1.bf16.msra.mxu1 %v1223_v53  ;;  %289 = vmatprep.subr.bf16.mxu0 %v1224_v54  ;;  %v397_v53 = vrot.slane %v388_v48, %v1700_v49 }
  0x35   :  { %606 = vmatprep.subr.bf16.mxu1 %v1226_v55 }
  0x37   :  { %290 = vmatpush1.bf16.msra.mxu0 %v1228_v56 }
  0x38   :  { %607 = vmatpush1.bf16.msra.mxu1 %v1229_v57  ;;  %291 = vmatprep.subr.bf16.mxu0 %v1230_v58 }
  0x39   :  { %608 = vmatprep.subr.bf16.mxu1 %v1232_v59 }
  0x3b   :  { %292 = vmatpush1.bf16.msra.mxu0 %v1234_v60 }
  0x3c   :  { %609 = vmatpush1.bf16.msra.mxu1 %v1235_v61  ;;  %293 = vmatprep.subr.bf16.mxu0 %v1236_v62 }
  0x3d   :  { %610 = vmatprep.subr.bf16.mxu1 %v1238_v63 }
  0x3f   :  { %294 = vmatpush1.bf16.msra.mxu0 %v1240_v0 }
  0x40   :  { %611 = vmatpush1.bf16.msra.mxu1 %v1241_v1  ;;  %889 = vmatprep.subr.bf16.mxu0 %v1250_v2 }
  0x41   :  { %1114 = vmatprep.subr.bf16.mxu1 %v1250_v2 }
  0x42   :  { %296 = vmatmul.mubr.bf16.vlgmr.msra.gmra.mrb[0].mxu0 %v1242_v3 }
  0x43   :  { %613 = vmatmul.mubr.bf16.vlgmr.msra.gmra.mrb[0].mxu1 %v1245_v4  ;;  %890 = vmatpush1.bf16.msra.mxu0 %v1248_v5 }
  0x44   :  { %1130 = vmatpush1.bf16.msra.mxu1 %v1248_v5  ;;  %891 = vmatprep.subr.bf16.mxu0 %v1253_v6 }
  0x45   :  { %1115 = vmatprep.subr.bf16.mxu1 %v1253_v6  ;;  %305 = vmatprep.mubr.bf16.mxu0 %v1287_v7 }
  0x46   :  { %622 = vmatprep.mubr.bf16.mxu1 %v1289_v8 }
  0x47   :  { %892 = vmatpush1.bf16.msra.mxu0 %v1251_v9 }
  0x48   :  { %1131 = vmatpush1.bf16.msra.mxu1 %v1251_v9  ;;  %893 = vmatprep.subr.bf16.mxu0 %v1256_v10 }
  0x49   :  { %1116 = vmatprep.subr.bf16.mxu1 %v1256_v10 }
  0x4a   :  { %306 = vmatmul.mubr.bf16.gmra.mrb[4].mxu0 %v1294_v11 }
  0x4b   :  { %623 = vmatmul.mubr.bf16.gmra.mrb[4].mxu1 %v1295_v12  ;;  %894 = vmatpush1.bf16.msra.mxu0 %v1254_v13 }
  0x4c   :  { %1132 = vmatpush1.bf16.msra.mxu1 %v1254_v13  ;;  %895 = vmatprep.subr.bf16.mxu0 %v1259_v14 }
  0x4d   :  { %1117 = vmatprep.subr.bf16.mxu1 %v1259_v14  ;;  %921 = vmatprep.mubr.bf16.mxu0 %v1304_v15 }
  0x4e   :  { %931 = vmatprep.mubr.bf16.mxu1 %v1307_v16 }
  0x4f   :  { %896 = vmatpush1.bf16.msra.mxu0 %v1257_v17 }
  0x50   :  { %1133 = vmatpush1.bf16.msra.mxu1 %v1257_v17  ;;  %897 = vmatprep.subr.bf16.mxu0 %v1262_v18 }
  0x51   :  { %1118 = vmatprep.subr.bf16.mxu1 %v1262_v18 }
  0x53   :  { %898 = vmatpush1.bf16.msra.mxu0 %v1260_v19 }
  0x54   :  { %1134 = vmatpush1.bf16.msra.mxu1 %v1260_v19  ;;  %899 = vmatprep.subr.bf16.mxu0 %v1265_v20 }
  0x55   :  { %1119 = vmatprep.subr.bf16.mxu1 %v1265_v20 }
  0x57   :  { %900 = vmatpush1.bf16.msra.mxu0 %v1263_v21 }
  0x58   :  { %1135 = vmatpush1.bf16.msra.mxu1 %v1263_v21  ;;  %901 = vmatprep.subr.bf16.mxu0 %v1268_v22 }
  0x59   :  { %1120 = vmatprep.subr.bf16.mxu1 %v1268_v22 }
  0x5b   :  { %902 = vmatpush1.bf16.msra.mxu0 %v1266_v23 }
  0x5c   :  { %1136 = vmatpush1.bf16.msra.mxu1 %v1266_v23  ;;  %903 = vmatprep.subr.bf16.mxu0 %v1271_v24 }
  0x5d   :  { %1121 = vmatprep.subr.bf16.mxu1 %v1271_v24 }
  0x5f   :  { %904 = vmatpush1.bf16.msra.mxu0 %v1269_v25 }
  0x60   :  { %1137 = vmatpush1.bf16.msra.mxu1 %v1269_v25  ;;  %905 = vmatprep.subr.bf16.mxu0 %v1274_v26 }
  0x61   :  { %1122 = vmatprep.subr.bf16.mxu1 %v1274_v26 }
  0x63   :  { %906 = vmatpush1.bf16.msra.mxu0 %v1272_v27 }
  0x64   :  { %1138 = vmatpush1.bf16.msra.mxu1 %v1272_v27  ;;  %907 = vmatprep.subr.bf16.mxu0 %v1277_v28 }
  0x65   :  { %1123 = vmatprep.subr.bf16.mxu1 %v1277_v28 }
  0x67   :  { %908 = vmatpush1.bf16.msra.mxu0 %v1275_v29 }
  0x68   :  { %1139 = vmatpush1.bf16.msra.mxu1 %v1275_v29  ;;  %909 = vmatprep.subr.bf16.mxu0 %v1280_v30 }
  0x69   :  { %1124 = vmatprep.subr.bf16.mxu1 %v1280_v30 }
  0x6b   :  { %910 = vmatpush1.bf16.msra.mxu0 %v1278_v31 }
  0x6c   :  { %1140 = vmatpush1.bf16.msra.mxu1 %v1278_v31  ;;  %911 = vmatprep.subr.bf16.mxu0 %v1283_v32 }
  0x6d   :  { %1125 = vmatprep.subr.bf16.mxu1 %v1283_v32 }
  0x6f   :  { %912 = vmatpush1.bf16.msra.mxu0 %v1281_v33 }
  0x70   :  { %1141 = vmatpush1.bf16.msra.mxu1 %v1281_v33  ;;  %913 = vmatprep.subr.bf16.mxu0 %v1286_v34 }
  0x71   :  { %1126 = vmatprep.subr.bf16.mxu1 %v1286_v34 }
  0x73   :  { %914 = vmatpush1.bf16.msra.mxu0 %v1284_v35 }
  0x74   :  { %1142 = vmatpush1.bf16.msra.mxu1 %v1284_v35  ;;  %915 = vmatprep.subr.bf16.mxu0 %v1293_v36 }
  0x75   :  { %1127 = vmatprep.subr.bf16.mxu1 %v1293_v36 }
  0x77   :  { %916 = vmatpush1.bf16.msra.mxu0 %v1291_v37 }
  0x78   :  { %1143 = vmatpush1.bf16.msra.mxu1 %v1291_v37  ;;  %917 = vmatprep.subr.bf16.mxu0 %v1298_v38 }
  0x79   :  { %1128 = vmatprep.subr.bf16.mxu1 %v1298_v38  ;;  %v697_v38 = vld [vmem:[%s1757_s8] sm:$0x3] }
  0x7b   :  { %918 = vmatpush1.bf16.msra.mxu0 %v1296_v39 }
  0x7c   :  { %1144 = vmatpush1.bf16.msra.mxu1 %v1296_v39  ;;  %919 = vmatprep.subr.bf16.mxu0 %v1301_v40  ;;  %v702_v39 = vrot.slane %v697_v38, %v1692_v46 }
  0x7d   :  { %1129 = vmatprep.subr.bf16.mxu1 %v1301_v40  ;;  %v706_v40 = vrot.slane %v697_v38, %v1700_v49 }
  0x7f   :  { %920 = vmatpush1.bf16.msra.mxu0 %v1299_v41 }
  0x80   :  { %1145 = vmatpush1.bf16.msra.mxu1 %v1299_v41 }
  0x82   :  { %922 = vmatmul.mubr.bf16.vlgmr.msra.gmra.mrb[8].mxu0 %v1302_v42 }
  0x83   :  { %932 = vmatmul.mubr.bf16.vlgmr.msra.gmra.mrb[8].mxu1 %v1305_v43 }
 0x115   :  { %v297_v54 = vpop.f32.mrb[0].mxu0 }
 0x116   :  { %v614_v55 = vpop.f32.mrb[0].mxu1  ;;  %v298_v56 = vadd.f32 %v297_v54, %v76_v50  ;;  %v299_v58 = vpop.f32.mrb[1].mxu0 }
 0x117   :  { %v615_v57 = vadd.f32 %v614_v55, %v393_v51  ;;  %v616_v59 = vpop.f32.mrb[1].mxu1  ;;  %v300_v60 = vadd.f32 %v299_v58, %v80_v52  ;;  %v301_v62 = vpop.f32.mrb[2].mxu0 }
 0x118   :  { %v617_v61 = vadd.f32 %v616_v59, %v397_v53  ;;  %v618_v63 = vpop.f32.mrb[2].mxu1  ;;  %v316_v0 = vmul.f32 0.088388346, %v298_v56  ;;  %v302_v1 = vadd.f32 %v301_v62, %v76_v50  ;;  %v303_v3 = vpop.f32.mrb[3].mxu0 }
 0x119   :  { %v619_v2 = vadd.f32 %v618_v63, %v393_v51  ;;  %v620_v4 = vpop.f32.mrb[3].mxu1  ;;  %v317_v5 = vmul.f32 0.088388346, %v300_v60  ;;  %v304_v7 = vadd.f32 %v303_v3, %v80_v52 }
 0x11a   :  { %v1106_v6 = vpack.c.bf16 %v617_v61, %v615_v57  ;;  %v621_v8 = vadd.f32 %v620_v4, %v397_v53  ;;  %v318_v9 = vmul.f32 0.088388346, %v302_v1 }
 0x11b   :  { %v1102_v10 = vpack.c.bf16 %v317_v5, %v316_v0  ;;  %v319_v11 = vmul.f32 0.088388346, %v304_v7 }
 0x11c   :  { %657 = vst [vmem:[%s1755_s10] sm:$0xff] %v1106_v6  ;;  %v1107_v12 = vpack.c.bf16 %v621_v8, %v619_v2 }
 0x11d   :  { %348 = vst [vmem:[%s1756_s9] sm:$0xff] %v1102_v10  ;;  %v1103_v13 = vpack.c.bf16 %v319_v11, %v318_v9  ;;  %v307_v14 = vpop.f32.mrb[4].mxu0 }
 0x11e   :  { %658 = vst [vmem:[%s1755_s10 + $0x8] sm:$0xff] %v1107_v12  ;;  %v624_v15 = vpop.f32.mrb[4].mxu1  ;;  %v308_v16 = vadd.f32 %v307_v14, %v76_v50  ;;  %v309_v18 = vpop.f32.mrb[5].mxu0 }
 0x11f   :  { %v625_v17 = vadd.f32 %v624_v15, %v393_v51  ;;  %v626_v19 = vpop.f32.mrb[5].mxu1  ;;  %349 = vst [vmem:[%s1756_s9 + $0x8] sm:$0xff] %v1103_v13  ;;  %v310_v20 = vadd.f32 %v309_v18, %v80_v52  ;;  %v311_v22 = vpop.f32.mrb[6].mxu0 }
 0x120   :  { %v627_v21 = vadd.f32 %v626_v19, %v397_v53  ;;  %v628_v23 = vpop.f32.mrb[6].mxu1  ;;  %v320_v24 = vmul.f32 0.088388346, %v308_v16  ;;  %v312_v25 = vadd.f32 %v311_v22, %v76_v50  ;;  %v313_v27 = vpop.f32.mrb[7].mxu0 }
 0x121   :  { %v629_v26 = vadd.f32 %v628_v23, %v393_v51  ;;  %v630_v28 = vpop.f32.mrb[7].mxu1  ;;  %v321_v29 = vmul.f32 0.088388346, %v310_v20  ;;  %v314_v31 = vadd.f32 %v313_v27, %v80_v52 }
 0x122   :  { %v1108_v30 = vpack.c.bf16 %v627_v21, %v625_v17  ;;  %v631_v32 = vadd.f32 %v630_v28, %v397_v53  ;;  %v322_v33 = vmul.f32 0.088388346, %v312_v25 }
 0x123   :  { %v1104_v34 = vpack.c.bf16 %v321_v29, %v320_v24  ;;  %v323_v35 = vmul.f32 0.088388346, %v314_v31 }
 0x124   :  { %659 = vst [vmem:[%s1755_s10 + $0x10] sm:$0xff] %v1108_v30  ;;  %v1109_v36 = vpack.c.bf16 %v631_v32, %v629_v26 }
 0x125   :  { %350 = vst [vmem:[%s1756_s9 + $0x10] sm:$0xff] %v1104_v34  ;;  %v1105_v37 = vpack.c.bf16 %v323_v35, %v322_v33 }
 0x126   :  { %660 = vst [vmem:[%s1755_s10 + $0x18] sm:$0xff] %v1109_v36 }
 0x127   :  { %351 = vst [vmem:[%s1756_s9 + $0x18] sm:$0xff] %v1105_v37 }
 0x155   :  { %v923_v41 = vpop.f32.mrb[8].mxu0 }
 0x156   :  { %v933_v42 = vpop.f32.mrb[8].mxu1  ;;  %v924_v43 = vadd.f32 %v923_v41, %v702_v39  ;;  %v925_v45 = vpop.f32.mrb[9].mxu0 }
 0x157   :  { %v934_v44 = vadd.f32 %v933_v42, %v702_v39  ;;  %v935_v47 = vpop.f32.mrb[9].mxu1  ;;  %v926_v48 = vadd.f32 %v925_v45, %v706_v40  ;;  %v927_v51 = vpop.f32.mrb[10].mxu0 }
 0x158   :  { %v936_v50 = vadd.f32 %v935_v47, %v706_v40  ;;  %v937_v52 = vpop.f32.mrb[10].mxu1  ;;  %v928_v53 = vadd.f32 %v927_v51, %v702_v39  ;;  %v929_v55 = vpop.f32.mrb[11].mxu0 }
 0x159   :  { %v938_v54 = vadd.f32 %v937_v52, %v702_v39  ;;  %v939_v56 = vpop.f32.mrb[11].mxu1  ;;  %v1110_v57 = vpack.c.bf16 %v926_v48, %v924_v43  ;;  %v930_v59 = vadd.f32 %v929_v55, %v706_v40 }
 0x15a   :  { %v1112_v58 = vpack.c.bf16 %v936_v50, %v934_v44  ;;  %v940_v46 = vadd.f32 %v939_v56, %v706_v40 }
 0x15b   :  { %966 = vst [vmem:[%s1758_s11] sm:$0xff] %v1110_v57  ;;  %v1111_v49 = vpack.c.bf16 %v930_v59, %v928_v53 }
 0x15c   :  { %968 = vst [vmem:[%s1758_s11 + $0x10] sm:$0xff] %v1112_v58  ;;  %v1113_v60 = vpack.c.bf16 %v940_v46, %v938_v54 }
 0x15d   :  { %967 = vst [vmem:[%s1758_s11 + $0x8] sm:$0xff] %v1111_v49 }
 0x15e   :  { %969 = vst [vmem:[%s1758_s11 + $0x18] sm:$0xff] %v1113_v60 }

</bundles_post_ra>
